<compile_context>
chip_gen: v7x
topology: tpu7x:2x2x1
jax: 0.10.0
libtpu: 0.0.40
codegen_flags: <defaults>
</compile_context>

<pallas_src>
import functools

import numpy as np
import jax
import jax.numpy as jnp
from jax.experimental import pallas as pl
from jax.experimental.pallas import tpu as pltpu


# ---------------------------------------------------------------------------
# Spatial operators as matrices (built once in numpy — glue, not hot path).
# ---------------------------------------------------------------------------
def _adaptive_pool_matrix(in_size, out_size):
    """P (out, in) s.t. P @ x == AdaptiveAvgPool1d(out)(x)."""
    P = np.zeros((out_size, in_size), np.float32)
    for i in range(out_size):
        start = (i * in_size) // out_size
        end = -(-((i + 1) * in_size) // out_size)  # ceil
        P[i, start:end] = 1.0 / (end - start)
    return P


def _bilinear_matrix(out_size, in_size):
    """L (out, in) matching F.interpolate(mode='bilinear', align_corners=False)."""
    L = np.zeros((out_size, in_size), np.float32)
    scale = in_size / out_size
    for o in range(out_size):
        src = (o + 0.5) * scale - 0.5
        src = max(src, 0.0)
        i0 = int(np.floor(src))
        lam = src - i0
        i0 = min(i0, in_size - 1)
        i1 = min(i0 + 1, in_size - 1)
        L[o, i0] += 1.0 - lam
        L[o, i1] += lam
    return L


def _round_up(x, m):
    return ((x + m - 1) // m) * m


# ---------------------------------------------------------------------------
# Kernel 1: fused PPM stage.  One invocation per image produces the whole
# concat slab:  [x | branch0 | branch1 | branch2 | branch3]  (channels-last).
# branch_b = U_b @ ReLU( (P_b @ x) @ W_b + bias_b )   (BN folded into W_b, bias_b)
# ---------------------------------------------------------------------------
def _ppm_concat_kernel(x_ref, p_ref, u_ref, w_ref, b_ref, o_ref, y_ref, *,
                       cin, m, branch_offs):
    x = x_ref[0]                                                     # (HW, Cin) bf16
    # pass-through of conv_out into the concat slab (channel offset 0)
    o_ref[0, :, 0:cin] = x
    # all four adaptive average pools as ONE stacked matmul
    pooled = jnp.dot(p_ref[...], x,
                     preferred_element_type=jnp.float32)             # (SSPT, Cin) f32
    # Per-branch 1x1 conv (+ folded BN) + ReLU, written into a block-diagonal
    # (SSPT, B*M) slab so that all four bilinear upsamples become one matmul
    # with a lane-dense 128-deep contraction.
    y_ref[...] = jnp.zeros_like(y_ref)
    for b, (off, ssp) in enumerate(branch_offs):                     # static unroll
        pb = pooled[off:off + ssp].astype(jnp.bfloat16)              # (ssp, Cin)
        yb = jnp.dot(pb, w_ref[b], preferred_element_type=jnp.float32) + b_ref[b]
        yb = jnp.maximum(yb, 0.0)                                    # ReLU (f32)
        # NOTE: padded pooled rows give ReLU(bias) != 0 here, but the matching
        # columns of U_all are zero, so they never reach the output (invariant
        # preserved from the original version).
        y_ref[off:off + ssp, b * m:(b + 1) * m] = yb.astype(y_ref.dtype)
    up = jnp.dot(u_ref[...], y_ref[...],
                 preferred_element_type=jnp.float32)                 # (HW, B*M) f32
    o_ref[0, :, cin:cin + up.shape[1]] = up.astype(o_ref.dtype)


def ppm_concat(x_bf16, params):
    N, HW, Cin = x_bf16.shape
    P_all, U_all = params["P_all"], params["U_all"]
    w_all, b_all = params["w_all"], params["b_all"]
    SSPT = P_all.shape[0]
    B, _, M = w_all.shape
    Cc = Cin + B * M
    kernel = functools.partial(_ppm_concat_kernel, cin=Cin, m=M,
                               branch_offs=params["branch_offs"])
    return pl.pallas_call(
        kernel,
        out_shape=jax.ShapeDtypeStruct((N, HW, Cc), jnp.bfloat16),
        grid=(N,),
        in_specs=[
            pl.BlockSpec((1, HW, Cin), lambda n: (n, 0, 0)),
            pl.BlockSpec((SSPT, HW), lambda n: (0, 0)),
            pl.BlockSpec((HW, SSPT), lambda n: (0, 0)),
            pl.BlockSpec((B, Cin, M), lambda n: (0, 0, 0)),
            pl.BlockSpec((B, 1, M), lambda n: (0, 0, 0)),
        ],
        out_specs=pl.BlockSpec((1, HW, Cc), lambda n: (n, 0, 0)),
        scratch_shapes=[pltpu.VMEM((SSPT, B * M), jnp.bfloat16)],
        compiler_params=pltpu.CompilerParams(
            dimension_semantics=("parallel",),
            vmem_limit_bytes=64 * 1024 * 1024),
    )(x_bf16, P_all, U_all, w_all, b_all)


# ---------------------------------------------------------------------------
# Kernel 2: conv_last head.
#   3x3 conv (BN folded) over the spatially padded, row-major flattened slab:
#   the tap (dy, dx) contribution to output raster index g (= r*Wp + c) is
#   x_pad_flat[g + dy*Wp + dx] @ w3[dy*3+dx]  — 9 shifted matmuls into a VMEM
#   f32 accumulator; then ReLU, (Dropout2d = identity), 1x1 conv (+bias) with
#   a lane-dense 128-padded class dim.
# ---------------------------------------------------------------------------
def _head_kernel(xp_ref, w3_ref, b3_ref, wl_ref, bl_ref, o_ref, acc_ref, *,
                 wp, lout):
    acc_ref[...] = jnp.zeros_like(acc_ref)
    for dy in range(3):                                              # static unroll
        for dx in range(3):
            off = dy * wp + dx
            xs = xp_ref[0, pl.ds(off, lout), :]                      # (LOUT, Cc) bf16
            acc_ref[...] += jnp.dot(xs, w3_ref[dy * 3 + dx],
                                    preferred_element_type=jnp.float32)
    y = jnp.maximum(acc_ref[...] + b3_ref[...], 0.0)                 # ReLU (f32)
    # Dropout2d(0.1) is identity at inference.
    o_ref[0] = jnp.dot(y.astype(jnp.bfloat16), wl_ref[...],
                       preferred_element_type=jnp.float32) + bl_ref[...]


def head(flat, w3, b3, wl, bl, *, H, W):
    N, PLEN, Cc = flat.shape
    Wp = W + 2
    LOUT = H * Wp
    M = w3.shape[2]
    NC = wl.shape[1]                                                 # 128 (padded)
    kernel = functools.partial(_head_kernel, wp=Wp, lout=LOUT)
    return pl.pallas_call(
        kernel,
        out_shape=jax.ShapeDtypeStruct((N, LOUT, NC), jnp.float32),
        grid=(N,),
        in_specs=[
            pl.BlockSpec((1, PLEN, Cc), lambda n: (n, 0, 0)),
            pl.BlockSpec((9, Cc, M), lambda n: (0, 0, 0)),
            pl.BlockSpec((1, M), lambda n: (0, 0)),
            pl.BlockSpec((M, NC), lambda n: (0, 0)),
            pl.BlockSpec((1, NC), lambda n: (0, 0)),
        ],
        out_specs=pl.BlockSpec((1, LOUT, NC), lambda n: (n, 0, 0)),
        scratch_shapes=[pltpu.VMEM((LOUT, M), jnp.float32)],
        compiler_params=pltpu.CompilerParams(
            dimension_semantics=("parallel",),
            vmem_limit_bytes=64 * 1024 * 1024),
    )(flat, w3, b3, wl, bl)


# ---------------------------------------------------------------------------
# Parameter init (deterministic, synthetic) with BN folding, bf16 weights.
# ---------------------------------------------------------------------------
def init_params(key, fc_dim, ppm_dim, num_classes, pool_scales, H, W):
    eps = 1e-5
    HW = H * W
    B = len(pool_scales)
    keys = iter(jax.random.split(key, 4 * B + 8))

    def bn_fold(k, n):
        k1, k2, k3, k4 = jax.random.split(k, 4)
        gamma = jax.random.uniform(k1, (n,), jnp.float32, 0.5, 1.5)
        beta = 0.1 * jax.random.normal(k2, (n,), jnp.float32)
        mean = 0.1 * jax.random.normal(k3, (n,), jnp.float32)
        var = jax.random.uniform(k4, (n,), jnp.float32, 0.5, 1.5)
        scale = gamma / jnp.sqrt(var + eps)
        return scale, beta - mean * scale

    branch_offs, P_blocks, U_blocks, Ws, Bs = [], [], [], [], []
    off = 0
    for s in pool_scales:
        Ph, Pw = _adaptive_pool_matrix(H, s), _adaptive_pool_matrix(W, s)
        Lh, Lw = _bilinear_matrix(H, s), _bilinear_matrix(W, s)
        ss = s * s
        ssp = _round_up(ss, 8)                      # pad pooled-grid dim to sublanes
        P = np.zeros((ssp, HW), np.float32); P[:ss] = np.kron(Ph, Pw)
        U = np.zeros((HW, ssp), np.float32); U[:, :ss] = np.kron(Lh, Lw)
        P_blocks.append(P); U_blocks.append(U)
        branch_offs.append((off, ssp)); off += ssp
        w = jax.random.normal(next(keys), (fc_dim, ppm_dim), jnp.float32) / np.sqrt(fc_dim)
        scale, shift = bn_fold(next(keys), ppm_dim)
        Ws.append(w * scale[None, :]); Bs.append(shift[None, :])

    SSPT = max(128, _round_up(off, 8))              # lane-dense stacked pooled dim
    P_all = np.zeros((SSPT, HW), np.float32); P_all[:off] = np.concatenate(P_blocks, 0)
    U_all = np.zeros((HW, SSPT), np.float32); U_all[:, :off] = np.concatenate(U_blocks, 1)
    w_all = jnp.stack(Ws)                           # (B, Cin, M)
    b_all = jnp.stack(Bs)                           # (B, 1, M)

    Cc = fc_dim + B * ppm_dim
    w3 = jax.random.normal(next(keys), (9, Cc, ppm_dim), jnp.float32) / np.sqrt(9 * Cc)
    scale3, shift3 = bn_fold(next(keys), ppm_dim)
    w3 = w3 * scale3[None, None, :]
    b3 = shift3[None, :]
    wl = jax.random.normal(next(keys), (ppm_dim, num_classes), jnp.float32) / np.sqrt(ppm_dim)
    bl = 0.1 * jax.random.normal(next(keys), (1, num_classes), jnp.float32)

    NCP = max(128, _round_up(num_classes, 128))     # lane-dense class dim
    wl_pad = jnp.zeros((ppm_dim, NCP), jnp.float32).at[:, :num_classes].set(wl)
    bl_pad = jnp.zeros((1, NCP), jnp.float32).at[:, :num_classes].set(bl)

    plen = _round_up((H + 2) * (W + 2) + 2, 8)      # flat padded-image length

    return {
        "branch_offs": tuple(branch_offs),
        "num_classes": num_classes,
        "plen": plen,
        # bf16 copies feed the MXU (accumulation stays f32 in-kernel)
        "P_all": jnp.asarray(P_all).astype(jnp.bfloat16),
        "U_all": jnp.asarray(U_all).astype(jnp.bfloat16),
        "w_all": w_all.astype(jnp.bfloat16),
        "b_all": b_all,                              # f32 (elementwise add)
        "w3": w3.astype(jnp.bfloat16),
        "b3": b3,                                    # f32
        "wl": wl_pad.astype(jnp.bfloat16),
        "bl": bl_pad,                                # f32
    }


# ---------------------------------------------------------------------------
# Forward (glue in JAX, hot paths in the two Pallas kernels).
# ---------------------------------------------------------------------------
def ppm_bilinear_forward(x_nchw, params):
    N, C, H, W = x_nchw.shape
    HW = H * W
    x = jnp.transpose(x_nchw, (0, 2, 3, 1)).reshape(N, HW, C).astype(jnp.bfloat16)
    feat = ppm_concat(x, params)                     # (N, HW, Cc) bf16 concat slab
    Cc = feat.shape[-1]
    Hp, Wp = H + 2, W + 2
    PLEN = params["plen"]
    flat = jnp.pad(feat.reshape(N, H, W, Cc), ((0, 0), (1, 1), (1, 1), (0, 0)))
    flat = flat.reshape(N, Hp * Wp, Cc)
    flat = jnp.pad(flat, ((0, 0), (0, PLEN - Hp * Wp), (0, 0)))
    out = head(flat, params["w3"], params["b3"], params["wl"], params["bl"], H=H, W=W)
    ncls = params["num_classes"]
    out = out.reshape(N, H, Wp, -1)[:, :, :W, :ncls]  # drop garbage cols / pad classes
    return jnp.transpose(out, (0, 3, 1, 2))           # NCHW


# ---------------------------------------------------------------------------
# Pure-JAX reference.  It mirrors the kernel's bf16 operand rounding so the
# check isolates the kernel's indexing / fusion / accumulation correctness.
# ---------------------------------------------------------------------------
def reference_forward(x_nchw, params):
    f32 = jnp.float32
    P = params["P_all"].astype(f32); U = params["U_all"].astype(f32)
    Wb = params["w_all"].astype(f32); Bb = params["b_all"]
    W3 = params["w3"].astype(f32); b3 = params["b3"]
    Wl = params["wl"].astype(f32); bl = params["bl"]
    ncls = params["num_classes"]
    N, C, H, Wd = x_nchw.shape
    HW = H * Wd
    x = jnp.transpose(x_nchw, (0, 2, 3, 1)).reshape(N, HW, C)
    x = x.astype(jnp.bfloat16).astype(f32)
    pooled = jnp.einsum("sp,npc->nsc", P, x)
    feats = [x]
    for b, (off, ssp) in enumerate(params["branch_offs"]):
        pb = pooled[:, off:off + ssp].astype(jnp.bfloat16).astype(f32)
        yb = jnp.maximum(jnp.einsum("nsc,cm->nsm", pb, Wb[b]) + Bb[b], 0.0)
        yb = yb.astype(jnp.bfloat16).astype(f32)
        up = jnp.einsum("ps,nsm->npm", U[:, off:off + ssp], yb)
        feats.append(up.astype(jnp.bfloat16).astype(f32))
    feat = jnp.concatenate(feats, axis=-1)
    feat_pad = jnp.pad(feat.reshape(N, H, Wd, -1), ((0, 0), (1, 1), (1, 1), (0, 0)))
    acc = 0.0
    for dy in range(3):
        for dx in range(3):
            patch = feat_pad[:, dy:dy + H, dx:dx + Wd, :].reshape(N, HW, -1)
            acc = acc + jnp.einsum("npc,cm->npm", patch, W3[dy * 3 + dx])
    y = jnp.maximum(acc + b3, 0.0).astype(jnp.bfloat16).astype(f32)
    out = (jnp.einsum("npm,mk->npk", y, Wl) + bl)[..., :ncls]
    return out.reshape(N, H, Wd, -1).transpose(0, 3, 1, 2)


if __name__ == "__main__":
    num_classes = 7
    fc_dim = 64        # stands in for fc_dim=2048 (kept small)
    ppm_dim = 64       # stands in for the hard-coded 512 PPM/head channels (kept small)
    pool_scales = (1, 2, 3, 6)
    N, H, W = 2, 16, 16

    key = jax.random.PRNGKey(0)
    kx, kp = jax.random.split(key)
    x = jax.random.normal(kx, (N, fc_dim, H, W), jnp.float32)   # NCHW, like PyTorch
    params = init_params(kp, fc_dim, ppm_dim, num_classes, pool_scales, H, W)

    out = jax.block_until_ready(ppm_bilinear_forward(x, params))
    assert out.shape == (N, num_classes, H, W), out.shape

    ref = jax.block_until_ready(reference_forward(x, params))
    rel = float(jnp.max(jnp.abs(out - ref)) / (jnp.max(jnp.abs(ref)) + 1e-6))
    if rel < 1e-2:
        print("KERNEL_OK")
    else:
        raise AssertionError(f"Pallas/JAX mismatch: rel max err = {rel}")
</pallas_src>

<mosaic_0001>
module attributes {stable_mosaic.version = 11 : i64} {
  func.func @_ppm_concat_kernel(%arg0: i32, %arg1: memref<1x256x64xbf16, #tpu.memory_space<vmem>>, %arg2: memref<128x256xbf16, #tpu.memory_space<vmem>>, %arg3: memref<256x128xbf16, #tpu.memory_space<vmem>>, %arg4: memref<4x64x64xbf16, #tpu.memory_space<vmem>>, %arg5: memref<4x1x64xf32, #tpu.memory_space<vmem>>, %arg6: memref<1x256x320xbf16, #tpu.memory_space<vmem>>, %arg7: memref<128x256xbf16, #tpu.memory_space<vmem>>) attributes {dimension_semantics = [#tpu.dimension_semantics<parallel>], iteration_bounds = array<i64: 2>, scalar_prefetch = 0 : i64, scratch_operands = 1 : i64, tpu.core_type = #tpu.core_type<tc>, window_params = [{transform_indices = @transform_0, window_bounds = array<i64: 1, 256, 64>}, {pipeline_mode = #tpu.pipeline_mode<synchronous>, transform_indices = @transform_1, window_bounds = array<i64: 128, 256>}, {pipeline_mode = #tpu.pipeline_mode<synchronous>, transform_indices = @transform_2, window_bounds = array<i64: 256, 128>}, {pipeline_mode = #tpu.pipeline_mode<synchronous>, transform_indices = @transform_3, window_bounds = array<i64: 4, 64, 64>}, {pipeline_mode = #tpu.pipeline_mode<synchronous>, transform_indices = @transform_4, window_bounds = array<i64: 4, 1, 64>}, {transform_indices = @transform_5, window_bounds = array<i64: 1, 256, 320>}]} {
    %c0 = arith.constant 0 : index
    %c0_0 = arith.constant 0 : index
    %c0_1 = arith.constant 0 : index
    %0 = vector.load %arg1[%c0, %c0_0, %c0_1] : memref<1x256x64xbf16, #tpu.memory_space<vmem>>, vector<1x256x64xbf16>
    %1 = vector.shape_cast %0 : vector<1x256x64xbf16> to vector<256x64xbf16>
    %c0_2 = arith.constant 0 : index
    %c0_3 = arith.constant 0 : index
    %c0_4 = arith.constant 0 : index
    %2 = vector.load %arg6[%c0_2, %c0_3, %c0_4] : memref<1x256x320xbf16, #tpu.memory_space<vmem>>, vector<1x256x64xbf16>
    %3 = vector.shape_cast %2 : vector<1x256x64xbf16> to vector<256x64xbf16>
    %4 = vector.shape_cast %1 : vector<256x64xbf16> to vector<1x256x64xbf16>
    tpu.vector_store %arg6[%c0_2, %c0_3, %c0_4], %4 {strides = array<i32>} : memref<1x256x320xbf16, #tpu.memory_space<vmem>>, vector<1x256x64xbf16>,
    %c0_5 = arith.constant 0 : index
    %c0_6 = arith.constant 0 : index
    %5 = vector.load %arg2[%c0_5, %c0_6] : memref<128x256xbf16, #tpu.memory_space<vmem>>, vector<128x256xbf16>
    %cst = arith.constant dense<0.000000e+00> : vector<128x64xf32>
    %6 = tpu.matmul %5, %1, %cst {dimension_numbers = #tpu.dot_dimension_numbers<[1], [0], [0], [1], [0, 0, 1, 1], [], []>} : vector<128x256xbf16>, vector<256x64xbf16>, vector<128x64xf32> -> vector<128x64xf32>
    %cst_7 = arith.constant 0.000000e+00 : bf16
    %7 = vector.broadcast %cst_7 : bf16 to vector<128x256xbf16>
    %c0_8 = arith.constant 0 : index
    %c0_9 = arith.constant 0 : index
    %8 = vector.load %arg7[%c0_8, %c0_9] : memref<128x256xbf16, #tpu.memory_space<vmem>>, vector<128x256xbf16>
    tpu.vector_store %arg7[%c0_8, %c0_9], %7 {strides = array<i32>} : memref<128x256xbf16, #tpu.memory_space<vmem>>, vector<128x256xbf16>,
    %9 = vector.extract_strided_slice %6 {offsets = [0, 0], sizes = [8, 64], strides = [1, 1]} : vector<128x64xf32> to vector<8x64xf32>
    %10 = arith.truncf %9 : vector<8x64xf32> to vector<8x64xbf16>
    %c0_10 = arith.constant 0 : index
    %c0_11 = arith.constant 0 : index
    %c0_12 = arith.constant 0 : index
    %11 = vector.load %arg4[%c0_10, %c0_11, %c0_12] : memref<4x64x64xbf16, #tpu.memory_space<vmem>>, vector<1x64x64xbf16>
    %12 = vector.shape_cast %11 : vector<1x64x64xbf16> to vector<64x64xbf16>
    %cst_13 = arith.constant dense<0.000000e+00> : vector<8x64xf32>
    %13 = tpu.matmul %10, %12, %cst_13 {dimension_numbers = #tpu.dot_dimension_numbers<[1], [0], [0], [1], [0, 0, 1, 1], [], []>} : vector<8x64xbf16>, vector<64x64xbf16>, vector<8x64xf32> -> vector<8x64xf32>
    %c0_14 = arith.constant 0 : index
    %c0_15 = arith.constant 0 : index
    %c0_16 = arith.constant 0 : index
    %14 = vector.load %arg5[%c0_14, %c0_15, %c0_16] : memref<4x1x64xf32, #tpu.memory_space<vmem>>, vector<1x1x64xf32>
    %15 = vector.shape_cast %14 : vector<1x1x64xf32> to vector<1x64xf32>
    %16 = vector.broadcast %15 : vector<1x64xf32> to vector<8x64xf32>
    %17 = arith.addf %13, %16 : vector<8x64xf32>
    %cst_17 = arith.constant 0.000000e+00 : f32
    %18 = vector.broadcast %cst_17 : f32 to vector<8x64xf32>
    %19 = arith.maximumf %17, %18 : vector<8x64xf32>
    %20 = arith.truncf %19 : vector<8x64xf32> to vector<8x64xbf16>
    %c0_18 = arith.constant 0 : index
    %c0_19 = arith.constant 0 : index
    %21 = vector.load %arg7[%c0_18, %c0_19] : memref<128x256xbf16, #tpu.memory_space<vmem>>, vector<8x64xbf16>
    tpu.vector_store %arg7[%c0_18, %c0_19], %20 {strides = array<i32>} : memref<128x256xbf16, #tpu.memory_space<vmem>>, vector<8x64xbf16>,
    %22 = vector.extract_strided_slice %6 {offsets = [8, 0], sizes = [8, 64], strides = [1, 1]} : vector<128x64xf32> to vector<8x64xf32>
    %23 = arith.truncf %22 : vector<8x64xf32> to vector<8x64xbf16>
    %c1 = arith.constant 1 : index
    %c0_20 = arith.constant 0 : index
    %c0_21 = arith.constant 0 : index
    %24 = vector.load %arg4[%c1, %c0_20, %c0_21] : memref<4x64x64xbf16, #tpu.memory_space<vmem>>, vector<1x64x64xbf16>
    %25 = vector.shape_cast %24 : vector<1x64x64xbf16> to vector<64x64xbf16>
    %cst_22 = arith.constant dense<0.000000e+00> : vector<8x64xf32>
    %26 = tpu.matmul %23, %25, %cst_22 {dimension_numbers = #tpu.dot_dimension_numbers<[1], [0], [0], [1], [0, 0, 1, 1], [], []>} : vector<8x64xbf16>, vector<64x64xbf16>, vector<8x64xf32> -> vector<8x64xf32>
    %c1_23 = arith.constant 1 : index
    %c0_24 = arith.constant 0 : index
    %c0_25 = arith.constant 0 : index
    %27 = vector.load %arg5[%c1_23, %c0_24, %c0_25] : memref<4x1x64xf32, #tpu.memory_space<vmem>>, vector<1x1x64xf32>
    %28 = vector.shape_cast %27 : vector<1x1x64xf32> to vector<1x64xf32>
    %29 = vector.broadcast %28 : vector<1x64xf32> to vector<8x64xf32>
    %30 = arith.addf %26, %29 : vector<8x64xf32>
    %cst_26 = arith.constant 0.000000e+00 : f32
    %31 = vector.broadcast %cst_26 : f32 to vector<8x64xf32>
    %32 = arith.maximumf %30, %31 : vector<8x64xf32>
    %33 = arith.truncf %32 : vector<8x64xf32> to vector<8x64xbf16>
    %c8 = arith.constant 8 : index
    %c64 = arith.constant 64 : index
    %34 = vector.load %arg7[%c8, %c64] : memref<128x256xbf16, #tpu.memory_space<vmem>>, vector<8x64xbf16>
    tpu.vector_store %arg7[%c8, %c64], %33 {strides = array<i32>} : memref<128x256xbf16, #tpu.memory_space<vmem>>, vector<8x64xbf16>,
    %35 = vector.extract_strided_slice %6 {offsets = [16, 0], sizes = [16, 64], strides = [1, 1]} : vector<128x64xf32> to vector<16x64xf32>
    %36 = arith.truncf %35 : vector<16x64xf32> to vector<16x64xbf16>
    %c2 = arith.constant 2 : index
    %c0_27 = arith.constant 0 : index
    %c0_28 = arith.constant 0 : index
    %37 = vector.load %arg4[%c2, %c0_27, %c0_28] : memref<4x64x64xbf16, #tpu.memory_space<vmem>>, vector<1x64x64xbf16>
    %38 = vector.shape_cast %37 : vector<1x64x64xbf16> to vector<64x64xbf16>
    %cst_29 = arith.constant dense<0.000000e+00> : vector<16x64xf32>
    %39 = tpu.matmul %36, %38, %cst_29 {dimension_numbers = #tpu.dot_dimension_numbers<[1], [0], [0], [1], [0, 0, 1, 1], [], []>} : vector<16x64xbf16>, vector<64x64xbf16>, vector<16x64xf32> -> vector<16x64xf32>
    %c2_30 = arith.constant 2 : index
    %c0_31 = arith.constant 0 : index
    %c0_32 = arith.constant 0 : index
    %40 = vector.load %arg5[%c2_30, %c0_31, %c0_32] : memref<4x1x64xf32, #tpu.memory_space<vmem>>, vector<1x1x64xf32>
    %41 = vector.shape_cast %40 : vector<1x1x64xf32> to vector<1x64xf32>
    %42 = vector.broadcast %41 : vector<1x64xf32> to vector<16x64xf32>
    %43 = arith.addf %39, %42 : vector<16x64xf32>
    %cst_33 = arith.constant 0.000000e+00 : f32
    %44 = vector.broadcast %cst_33 : f32 to vector<16x64xf32>
    %45 = arith.maximumf %43, %44 : vector<16x64xf32>
    %46 = arith.truncf %45 : vector<16x64xf32> to vector<16x64xbf16>
    %c16 = arith.constant 16 : index
    %c128 = arith.constant 128 : index
    %47 = vector.load %arg7[%c16, %c128] : memref<128x256xbf16, #tpu.memory_space<vmem>>, vector<16x64xbf16>
    tpu.vector_store %arg7[%c16, %c128], %46 {strides = array<i32>} : memref<128x256xbf16, #tpu.memory_space<vmem>>, vector<16x64xbf16>,
    %48 = vector.extract_strided_slice %6 {offsets = [32, 0], sizes = [40, 64], strides = [1, 1]} : vector<128x64xf32> to vector<40x64xf32>
    %49 = arith.truncf %48 : vector<40x64xf32> to vector<40x64xbf16>
    %c3 = arith.constant 3 : index
    %c0_34 = arith.constant 0 : index
    %c0_35 = arith.constant 0 : index
    %50 = vector.load %arg4[%c3, %c0_34, %c0_35] : memref<4x64x64xbf16, #tpu.memory_space<vmem>>, vector<1x64x64xbf16>
    %51 = vector.shape_cast %50 : vector<1x64x64xbf16> to vector<64x64xbf16>
    %cst_36 = arith.constant dense<0.000000e+00> : vector<40x64xf32>
    %52 = tpu.matmul %49, %51, %cst_36 {dimension_numbers = #tpu.dot_dimension_numbers<[1], [0], [0], [1], [0, 0, 1, 1], [], []>} : vector<40x64xbf16>, vector<64x64xbf16>, vector<40x64xf32> -> vector<40x64xf32>
    %c3_37 = arith.constant 3 : index
    %c0_38 = arith.constant 0 : index
    %c0_39 = arith.constant 0 : index
    %53 = vector.load %arg5[%c3_37, %c0_38, %c0_39] : memref<4x1x64xf32, #tpu.memory_space<vmem>>, vector<1x1x64xf32>
    %54 = vector.shape_cast %53 : vector<1x1x64xf32> to vector<1x64xf32>
    %55 = vector.broadcast %54 : vector<1x64xf32> to vector<40x64xf32>
    %56 = arith.addf %52, %55 : vector<40x64xf32>
    %cst_40 = arith.constant 0.000000e+00 : f32
    %57 = vector.broadcast %cst_40 : f32 to vector<40x64xf32>
    %58 = arith.maximumf %56, %57 : vector<40x64xf32>
    %59 = arith.truncf %58 : vector<40x64xf32> to vector<40x64xbf16>
    %c32 = arith.constant 32 : index
    %c192 = arith.constant 192 : index
    %60 = vector.load %arg7[%c32, %c192] : memref<128x256xbf16, #tpu.memory_space<vmem>>, vector<40x64xbf16>
    tpu.vector_store %arg7[%c32, %c192], %59 {strides = array<i32>} : memref<128x256xbf16, #tpu.memory_space<vmem>>, vector<40x64xbf16>,
    %c0_41 = arith.constant 0 : index
    %c0_42 = arith.constant 0 : index
    %61 = vector.load %arg3[%c0_41, %c0_42] : memref<256x128xbf16, #tpu.memory_space<vmem>>, vector<256x128xbf16>
    %c0_43 = arith.constant 0 : index
    %c0_44 = arith.constant 0 : index
    %62 = vector.load %arg7[%c0_43, %c0_44] : memref<128x256xbf16, #tpu.memory_space<vmem>>, vector<128x256xbf16>
    %cst_45 = arith.constant dense<0.000000e+00> : vector<256x256xf32>
    %63 = tpu.matmul %61, %62, %cst_45 {dimension_numbers = #tpu.dot_dimension_numbers<[1], [0], [0], [1], [0, 0, 1, 1], [], []>} : vector<256x128xbf16>, vector<128x256xbf16>, vector<256x256xf32> -> vector<256x256xf32>
    %64 = arith.truncf %63 : vector<256x256xf32> to vector<256x256xbf16>
    %c0_46 = arith.constant 0 : index
    %c0_47 = arith.constant 0 : index
    %c64_48 = arith.constant 64 : index
    %65 = vector.load %arg6[%c0_46, %c0_47, %c64_48] : memref<1x256x320xbf16, #tpu.memory_space<vmem>>, vector<1x256x256xbf16>
    %66 = vector.shape_cast %65 : vector<1x256x256xbf16> to vector<256x256xbf16>
    %67 = vector.shape_cast %64 : vector<256x256xbf16> to vector<1x256x256xbf16>
    tpu.vector_store %arg6[%c0_46, %c0_47, %c64_48], %67 {strides = array<i32>} : memref<1x256x320xbf16, #tpu.memory_space<vmem>>, vector<1x256x256xbf16>,
    return
  }
  func.func @transform_0(%arg0: i32) -> (i32, i32, i32) {
    %c0_i32 = arith.constant 0 : i32
    %c0_i32_0 = arith.constant 0 : i32
    %c0_i32_1 = arith.constant 0 : i32
    return %arg0, %c0_i32, %c0_i32_0 : i32, i32, i32
  }
  func.func @transform_1(%arg0: i32) -> (i32, i32) {
    %c0_i32 = arith.constant 0 : i32
    %c0_i32_0 = arith.constant 0 : i32
    %c0_i32_1 = arith.constant 0 : i32
    return %c0_i32, %c0_i32_0 : i32, i32
  }
  func.func @transform_2(%arg0: i32) -> (i32, i32) {
    %c0_i32 = arith.constant 0 : i32
    %c0_i32_0 = arith.constant 0 : i32
    %c0_i32_1 = arith.constant 0 : i32
    return %c0_i32, %c0_i32_0 : i32, i32
  }
  func.func @transform_3(%arg0: i32) -> (i32, i32, i32) {
    %c0_i32 = arith.constant 0 : i32
    %c0_i32_0 = arith.constant 0 : i32
    %c0_i32_1 = arith.constant 0 : i32
    %c0_i32_2 = arith.constant 0 : i32
    return %c0_i32, %c0_i32_0, %c0_i32_1 : i32, i32, i32
  }
  func.func @transform_4(%arg0: i32) -> (i32, i32, i32) {
    %c0_i32 = arith.constant 0 : i32
    %c0_i32_0 = arith.constant 0 : i32
    %c0_i32_1 = arith.constant 0 : i32
    %c0_i32_2 = arith.constant 0 : i32
    return %c0_i32, %c0_i32_0, %c0_i32_1 : i32, i32, i32
  }
  func.func @transform_5(%arg0: i32) -> (i32, i32, i32) {
    %c0_i32 = arith.constant 0 : i32
    %c0_i32_0 = arith.constant 0 : i32
    %c0_i32_1 = arith.constant 0 : i32
    return %arg0, %c0_i32, %c0_i32_0 : i32, i32, i32
  }
}

</mosaic_0001>

<bundles_post_ra>
// kernel: tpu_custom_call.1
= control target key start
LH: loop header
LB: loop body
LE: loop exit
PB: predicated region body
PF: predicated region fallthrough
CT: control target
= control target key end

     0   :  { %10 = vsyncpa [#allocation4], 0  ;;  %s3374_s0 = inlined_call_operand.hbm [shape: bf16[2,256,64], index: 0, kind: input, shape index: {}]   ;;  %s3375_s1 = inlined_call_operand.hbm [shape: bf16[128,256], index: 1, kind: input, shape index: {}]   ;;  %s3376_s2 = inlined_call_operand.hbm [shape: bf16[256,128], index: 2, kind: input, shape index: {}]   ;;  %s3377_s3 = inlined_call_operand.hbm [shape: bf16[4,64,64], index: 3, kind: input, shape index: {}]   ;;  %s3378_s4 = inlined_call_operand.hbm [shape: f32[4,1,64], index: 4, kind: input, shape index: {}]   ;;  %s3379_s5 = inlined_call_operand.hbm [shape: bf16[2,256,320], index: 5, kind: output, shape index: {}]  }
   0x1   :  { %12 = vsyncpa [#allocation4 + $0x1], 0 }
   0x2   :  { %13 = vsyncpa [#allocation7], 0 }
   0x3   :  { %14 = vsyncpa [#allocation10], 0 }
   0x4   :  { %15 = vsyncpa [#allocation5], 0 }
   0x5   :  { %17 = vsyncpa [#allocation5 + $0x1], 0  ;;  %s2690_s18 = smov 0   ;;  %s2692_s19 = smov 0  }
   0x6   :  { %s2694_s20 = smov 0   ;;  %s2696_s21 = smov 0  }
   0x7 LB: > { %s2711_s22 = sadd.s32 4294967295, %s2640_s21   ;;  %s1951_s23 = sadd.s32 4294967294, %s2640_s21   ;;  %s2640_s21 = sphi %s2696_s21, %s3404_s21   ;;  %s2636_s20 = sphi %s2694_s20, %s3403_s20   ;;  %s2632_s19 = sphi %s2692_s19, %s3402_s19   ;;  %s2628_s18 = sphi %s2690_s18, %s3401_s18  }
   0x8   : > { %p43_p0 = scmp.ne.s32.totalorder %s2632_s19, %s2628_s18  ;;  %p3380_p1 = scmp.eq.s32.totalorder %s2711_s22, 0 }
   0x9   : > { %p157_p3 = scmp.eq.s32.totalorder %s1951_s23, 1  ;;  %p1952_p5 = scmp.ge.s32.totalorder %s2640_s21, 1 }
   0xa   : > { %p2720_p4 = por %p3380_p1, %p43_p0  ;;  %p164_p7 = scmp.lt.s32.totalorder %s2640_s21, 3 }
   0xb   : > { %p2725_p6 = por %p157_p3, %p43_p0  ;;  %s2642_s27 = smov [#allocation6]  }
   0xc   : > { %s3383_s24 = scalar_select %p2720_p4, 1, 0 }
   0xd   : > { %s3384_s25 = scalar_select %p2725_p6, 1, 0 }
   0xe   : > { %p2730_p8 = pnand %p1952_p5, %p164_p7  ;;  %s176_s28 = sshll.u32 %s2642_s27, 4  ;;  %s177_s28 = int_to_ptr.vmem [resolvable:$true] %s176_s28 }
   0xf   : > { %s2643_s30 = smov [#allocation9]   ;;  %s2424_s9 = scalar_lea.hbm %s3375_s1, 2048 }
  0x10   : > { %s3385_s26 = scalar_select %p2730_p8, 1, 0 }
  0x11   : > { %p2289_p9 = pneg %p2730_p8  ;;  %s202_s6 = sshll.u32 %s2643_s30, 4  ;;  %s203_s6 = int_to_ptr.vmem [resolvable:$true] %s202_s6 }
  0x12   : > { %p2425_p12 = scmp.ne.s32.totalorder %s3375_s1, %s2424_s9  ;;  %p2431_p5 = scmp.lt.u32.totalorder %s2424_s9, %s3375_s1 }
  0x13   : > { %p2739_p11 = pnand %p2289_p9, %p3380_p1 }
  0x15   : > { %p2751_p13 = pneg %p2739_p11 }
  0x17   : > { %p2427_p0 = pnand %p2751_p13, %p2425_p12 }
  0x19   : > { %p2428_p3 = pneg %p2427_p0 }
  0x1b   : > { %p2433_p7 = pnand %p2431_p5, %p2428_p3 }
  0x1d   : > { %2436 = shalt.err (!%p2433_p7)
}
  0x1e   : > { %s2437_s15 = scalar_lea.vmem %s177_s28, 2048  ;;  %p2445_p2 = scmp.lt.s32.totalorder %s177_s28, %s177_s28 }
  0x1f   : > { %p2438_p9 = scmp.ne.s32.totalorder %s177_s28, %s2437_s15  ;;  %p2446_p6 = scmp.lt.s32.totalorder %s2437_s15, %s2437_s15 }
  0x21   : > { %p2440_p10 = pnand %p2438_p9, %p2751_p13  ;;  %p2447_p4 = por %p2446_p6, %p2445_p2 }
  0x23   : > { %p2441_p1 = pneg %p2440_p10 }
  0x25   : > { %p2448_p8 = pnand %p2447_p4, %p2441_p1 }
  0x27   : > { %2451 = shalt.err (!%p2448_p8)
}
  0x28   : > { %s2644_s16 = smov 128   ;;  %s2645_s17 = smov 8  }
  0x29   : > { %2292 = dma.hbm_to_vmem [thread:$0]  (!%p2739_p11), %s3375_s1, 2048, %s177_s28, [#allocation7], %s2644_s16, %s2644_s16, %s2645_s17  }
  0x2a   : > { %s2646_s30 = smov [#allocation8]   ;;  %s2452_s10 = scalar_lea.hbm %s3377_s3, 2048 }
  0x2b   : > { %s189_s7 = sshll.u32 %s2646_s30, 4  ;;  %p2453_p1 = scmp.ne.s32.totalorder %s3377_s3, %s2452_s10  ;;  %s190_s7 = int_to_ptr.vmem [resolvable:$true] %s189_s7 }
  0x2c   : > { %p2459_p6 = scmp.lt.u32.totalorder %s2452_s10, %s3377_s3 }
  0x2d   : > { %p2455_p2 = pnand %p2453_p1, %p2751_p13 }
  0x2f   : > { %p2456_p4 = pneg %p2455_p2 }
  0x31   : > { %p2461_p8 = pnand %p2459_p6, %p2456_p4 }
  0x33   : > { %2464 = shalt.err (!%p2461_p8)
}
  0x34   : > { %s2465_s28 = scalar_lea.vmem %s203_s6, 2048  ;;  %p2473_p3 = scmp.lt.s32.totalorder %s203_s6, %s203_s6 }
  0x35   : > { %p2466_p10 = scmp.ne.s32.totalorder %s203_s6, %s2465_s28  ;;  %p2474_p5 = scmp.lt.s32.totalorder %s2465_s28, %s2465_s28 }
  0x37   : > { %p2468_p12 = pnand %p2466_p10, %p2751_p13  ;;  %p2475_p7 = por %p2474_p5, %p2473_p3 }
  0x39   : > { %p2469_p0 = pneg %p2468_p12 }
  0x3b   : > { %p2476_p9 = pnand %p2475_p7, %p2469_p0 }
  0x3d   : > { %2479 = shalt.err (!%p2476_p9)
}
  0x3e   : > { %s2647_s16 = smov 64   ;;  %s2648_s17 = smov 4  }
  0x3f   : > { %2298 = dma.hbm_to_vmem [thread:$0]  (!%p2739_p11), %s3377_s3, 2048, %s203_s6, [#allocation10], %s2647_s16, %s2647_s16, %s2648_s17  }
  0x40   : > { %s2480_s9 = scalar_lea.hbm %s3376_s2, 2048 }
  0x41   : > { %p2481_p1 = scmp.ne.s32.totalorder %s3376_s2, %s2480_s9  ;;  %p2487_p6 = scmp.lt.u32.totalorder %s2480_s9, %s3376_s2 }
  0x43   : > { %p2483_p2 = pnand %p2481_p1, %p2751_p13 }
  0x45   : > { %p2484_p4 = pneg %p2483_p2 }
  0x47   : > { %p2489_p8 = pnand %p2487_p6, %p2484_p4 }
  0x49   : > { %2492 = shalt.err (!%p2489_p8)
}
  0x4a   : > { %s2493_s15 = scalar_lea.vmem %s190_s7, 2048  ;;  %p2501_p3 = scmp.lt.s32.totalorder %s190_s7, %s190_s7 }
  0x4b   : > { %p2494_p10 = scmp.ne.s32.totalorder %s190_s7, %s2493_s15  ;;  %p2502_p5 = scmp.lt.s32.totalorder %s2493_s15, %s2493_s15 }
  0x4d   : > { %p2496_p12 = pnand %p2494_p10, %p2751_p13  ;;  %p2503_p7 = por %p2502_p5, %p2501_p3 }
  0x4f   : > { %p2497_p0 = pneg %p2496_p12 }
  0x51   : > { %p2504_p9 = pnand %p2503_p7, %p2497_p0 }
  0x53   : > { %2507 = shalt.err (!%p2504_p9)
}
  0x54   : > { %2295 = dma.hbm_to_vmem [thread:$0]  (!%p2739_p11), %s3376_s2, 2048, %s190_s7, [#allocation7], %s2647_s16, %s2647_s16, %s2648_s17  }
  0x55   : > { %s2649_s23 = smov [#allocation11]   ;;  %s2508_s9 = scalar_lea.hbm %s3378_s4, 64 }
  0x56   : > { %s215_s27 = sshll.u32 %s2649_s23, 4  ;;  %p2509_p1 = scmp.ne.s32.totalorder %s3378_s4, %s2508_s9  ;;  %s216_s27 = int_to_ptr.vmem [resolvable:$true] %s215_s27 }
  0x57   : > { %p2515_p6 = scmp.lt.u32.totalorder %s2508_s9, %s3378_s4 }
  0x58   : > { %p2511_p2 = pnand %p2509_p1, %p2751_p13 }
  0x5a   : > { %p2512_p4 = pneg %p2511_p2 }
  0x5c   : > { %p2517_p8 = pnand %p2515_p6, %p2512_p4 }
  0x5e   : > { %2520 = shalt.err (!%p2517_p8)
}
  0x5f   : > { %s2521_s7 = scalar_lea.vmem %s216_s27, 64  ;;  %p2529_p3 = scmp.lt.s32.totalorder %s216_s27, %s216_s27 }
  0x60   : > { %p2522_p10 = scmp.ne.s32.totalorder %s216_s27, %s2521_s7  ;;  %p2530_p5 = scmp.lt.s32.totalorder %s2521_s7, %s2521_s7 }
  0x62   : > { %p2524_p12 = pnand %p2522_p10, %p2751_p13  ;;  %p2531_p7 = por %p2530_p5, %p2529_p3 }
  0x64   : > { %p2525_p0 = pneg %p2524_p12 }
  0x66   : > { %p2532_p9 = pnand %p2531_p7, %p2525_p0 }
  0x68   : > { %2535 = shalt.err (!%p2532_p9)
}
  0x69   : > { %s2650_s15 = smov 16   ;;  %s2651_s12 = smov 1  }
  0x6a   : > { %2301 = dma.hbm_to_vmem [thread:$0]  (!%p2739_p11), %s3378_s4, 64, %s216_s27, [#allocation10], %s2650_s15, %s2650_s15, %s2651_s12  }
  0x6b   : > { %s2828_s23 = sadd.s32 1, %s2640_s21   ;;  %s30_s8 = sadd.s32 1, %s2636_s20 }
  0x6c   : > { %s27_s30 = ssub.s32 %s2640_s21, %s2828_s23  ;;  %p37_p1 = scmp.ne.s32.totalorder %s2636_s20, %s2632_s19 }
  0x6d   : > { %p28_p13 = scmp.eq.s32.totalorder %s27_s30, 0  ;;  %p38_p2 = scmp.eq.s32.totalorder %s2640_s21, 0 }
  0x6e   : > { %p3388_p6 = scmp.eq.s32.totalorder %s2711_s22, 1  ;;  %p2314_p10 = scmp.lt.s32.totalorder %s2640_s21, 2 }
  0x6f   : > { %s2837_s9 = scalar_select %p28_p13, %s2636_s20, %s30_s8  }
  0x70   : > { %p39_p4 = por %p38_p2, %p37_p1  ;;  %p2841_p8 = por %p3388_p6, %p37_p1 }
  0x71   : > { %s229_s29 = sand.u32 1, %s2636_s20   ;;  %s2076_s27 = sshll.u32 %s2640_s21, 11 }
  0x72   : > { %s1958_s11 = sshll.u32 %s229_s29, 7  ;;  %s2851_s7 = scalar_lea.hbm %s3374_s0, %s2076_s27 }
  0x73   : > { %s233_s15 = scalar_lea.vmem [#allocation3], %s1958_s11  ;;  %p2855_p11 = pnand %p2314_p10, %p39_p4 }
  0x74   : > { %s240_s12 = sshll.u32 %s233_s15, 4  ;;  %s2859_s28 = scalar_lea.sflag [#allocation4], %s229_s29  ;;  %s2853_s12 = int_to_ptr.vmem [resolvable:$true] %s240_s12 }
  0x75   : > { %s2536_s30 = scalar_lea.hbm %s2851_s7, 2048  ;;  %p2538_p0 = pneg %p2855_p11 }
  0x76   : > { %p2537_p12 = scmp.ne.s32.totalorder %s2851_s7, %s2536_s30  ;;  %s2541_s27 = scalar_lea.hbm %s3374_s0, 4096 }
  0x77   : > { %p2542_p7 = scmp.lt.u32.totalorder %s2851_s7, %s3374_s0  ;;  %p2543_p9 = scmp.lt.u32.totalorder %s2541_s27, %s2536_s30 }
  0x78   : > { %p2539_p3 = pnand %p2538_p0, %p2537_p12  ;;  %p2545_p1 = scmp.lt.u32.totalorder %s2536_s30, %s2851_s7 }
  0x79   : > { %p2544_p13 = por %p2543_p9, %p2542_p7 }
  0x7a   : > { %p2540_p5 = pneg %p2539_p3 }
  0x7b   : > { %p2546_p2 = por %p2545_p1, %p2544_p13 }
  0x7d   : > { %p2547_p4 = pnand %p2546_p2, %p2540_p5 }
  0x7f   : > { %2550 = shalt.err (!%p2547_p4)
}
  0x80   : > { %s2551_s29 = scalar_lea.vmem %s2853_s12, 2048  ;;  %s2652_s15 = smov [#allocation3]  }
  0x81   : > { %p2552_p6 = scmp.ne.s32.totalorder %s2853_s12, %s2551_s29  ;;  %s2556_s8 = sshll.u32 %s2652_s15, 4  ;;  %s2557_s8 = int_to_ptr.vmem [resolvable:$false] %s2556_s8 }
  0x82   : > { %s2558_s11 = scalar_lea.vmem %s2557_s8, 4096  ;;  %p2559_p3 = scmp.lt.s32.totalorder %s2853_s12, %s2557_s8 }
  0x83   : > { %p2554_p10 = pnand %p2552_p6, %p2538_p0  ;;  %p2560_p7 = scmp.lt.s32.totalorder %s2558_s11, %s2551_s29 }
  0x85   : > { %p2555_p12 = pneg %p2554_p10  ;;  %p2561_p9 = por %p2560_p7, %p2559_p3 }
  0x87   : > { %p2562_p13 = pnand %p2561_p9, %p2555_p12 }
  0x89   : > { %2565 = shalt.err (!%p2562_p13)
}
  0x8a   : > { %2305 = dma.hbm_to_vmem [thread:$0]  (!%p2855_p11), %s2851_s7, 2048, %s2853_s12, %s2859_s28, %s2647_s16, %s2647_s16, %s2648_s17  }
  0x8b   : > { %p3391_p0 = scmp.ne.s32.totalorder %s3385_s26, 0 }
  0x8c   : > { %s2893_s30 = sand.u32 (!%p3391_p0), 1, %s2632_s19   ;;  %p3392_p5 = scmp.ne.s32.totalorder (!%p3391_p0), %s3383_s24, 0 }
  0x8d   : > { %252 = sbr.rel (%p3391_p0) target bundleno = 1240 (0x4d8), region = 40  ;;  %s1962_s27 = sshll.u32 (!%p3391_p0), %s2893_s30, 7 }
  0x8e   : > { %s255_s13 = scalar_lea.sflag (!%p3391_p0), [#allocation4], %s2893_s30  ;;  %s2897_s14 = scalar_lea.vmem (!%p3391_p0), [#allocation3], %s1962_s27 }
  0x94   : > { %2611 = dma.done.wait (%p3392_p5), %s255_s13, 2048  }
  0x95   : > { %2613 = vsyncadd (%p3392_p5), %s255_s13, 4294965248  ;;  %p3393_p11 = scmp.eq.s32.totalorder %s2711_s22, 0 }
  0x97   : > { %2615 = dma.done.wait (%p3393_p11), [#allocation7], 4096   ;;  %p3394_p1 = pmov %p3393_p11 }
  0x99   : > { %2617 = vsyncadd (%p3394_p1), [#allocation7], 4294963200  ;;  %p3395_p2 = pmov %p3394_p1 }
  0x9a   : > { %p3396_p4 = pmov %p3394_p1 }
  0x9b   : > { %2619 = dma.done.wait (%p3395_p2), [#allocation10], 2112  }
  0x9c   : > { %2621 = vsyncadd (%p3396_p4), [#allocation10], 4294965184  ;;  %s2267_s24 = smul.u32 384, %s2893_s30  ;;  %v2653_v0 = vmov 0.0   ;;  %vm334_vm0 = vcmask 519168   ;;  %v2383_v45 = vld [vmem:[#allocation9] sm:$0xff]  }
  0x9d   : > { %2195 = vmatprep.subr.bf16.mxu1 %v2653_v0  ;;  %v318_v1 = vld [vmem:[%s2897_s14 + $0x40] sm:$0xf]  ;;  %v319_v2 = vld [vmem:[%s2897_s14 + $0x44] sm:$0xf]  ;;  %v320_v6 = vld [vmem:[%s2897_s14 + $0x48] sm:$0xf] }
  0x9e   : > { %v302_v3 = vld [vmem:[%s2897_s14] sm:$0xf]  ;;  %s2916_s26 = scalar_lea.vmem [#allocation12], %s2267_s24  ;;  %v1991_v4 = vcombine.low %v318_v1, %v319_v2  ;;  %v303_v5 = vld [vmem:[%s2897_s14 + $0x4] sm:$0xf]  ;;  %2196 = vmatpush3.bf16.msra.mxu1 %v2383_v45  ;;  %v2384_v47 = vld [vmem:[#allocation9 + $0x8] sm:$0xff]  }
  0x9f   : > { %351 = vst.msk [vmem:[%s2916_s26 + $0xc0] sm:$0xf] %vm334_vm0, %v318_v1  ;;  %352 = vst.msk [vmem:[%s2916_s26 + $0xcc] sm:$0xf] %vm334_vm0, %v319_v2  ;;  %v321_v7 = vld [vmem:[%s2897_s14 + $0x4c] sm:$0xf]  ;;  %v1983_v8 = vcombine.low %v302_v3, %v303_v5  ;;  %2197 = vmatprep.subr.bf16.mxu1 %v2653_v0 }
  0xa0   : > { %335 = vst.msk [vmem:[%s2916_s26] sm:$0xf] %vm334_vm0, %v302_v3  ;;  %336 = vst.msk [vmem:[%s2916_s26 + $0xc] sm:$0xf] %vm334_vm0, %v303_v5  ;;  %v1992_v9 = vcombine.low %v320_v6, %v321_v7  ;;  %v304_v10 = vld [vmem:[%s2897_s14 + $0x8] sm:$0xf]  ;;  %2109 = vmatprep.subr.bf16.mxu0 %v1991_v4 }
  0xa1   : > { %353 = vst.msk [vmem:[%s2916_s26 + $0xd8] sm:$0xf] %vm334_vm0, %v320_v6  ;;  %354 = vst.msk [vmem:[%s2916_s26 + $0xe4] sm:$0xf] %vm334_vm0, %v321_v7  ;;  %v305_v11 = vld [vmem:[%s2897_s14 + $0xc] sm:$0xf]  ;;  %2110 = vmatpush3.bf16.msra.mxu0 %v1983_v8 }
  0xa2   : > { %v322_v12 = vld [vmem:[%s2897_s14 + $0x50] sm:$0xf]  ;;  %337 = vst.msk [vmem:[%s2916_s26 + $0x18] sm:$0xf] %vm334_vm0, %v304_v10  ;;  %338 = vst.msk [vmem:[%s2916_s26 + $0x24] sm:$0xf] %vm334_vm0, %v305_v11  ;;  %v1984_v16 = vcombine.low %v304_v10, %v305_v11  ;;  %2111 = vmatprep.subr.bf16.mxu0 %v1992_v9  ;;  %2198 = vmatpush3.bf16.msra.mxu1 %v2384_v47 }
  0xa3   : > { %v323_v13 = vld [vmem:[%s2897_s14 + $0x54] sm:$0xf]  ;;  %355 = vst.msk [vmem:[%s2916_s26 + $0xf0] sm:$0xf] %vm334_vm0, %v322_v12  ;;  %v306_v14 = vld [vmem:[%s2897_s14 + $0x10] sm:$0xf]  ;;  %2199 = vmatprep.subr.bf16.mxu1 %v2653_v0 }
  0xa4   : > { %v307_v15 = vld [vmem:[%s2897_s14 + $0x14] sm:$0xf]  ;;  %356 = vst.msk [vmem:[%s2916_s26 + $0xfc] sm:$0xf] %vm334_vm0, %v323_v13  ;;  %339 = vst.msk [vmem:[%s2916_s26 + $0x30] sm:$0xf] %vm334_vm0, %v306_v14  ;;  %v1993_v20 = vcombine.low %v322_v12, %v323_v13 }
  0xa5   : > { %340 = vst.msk [vmem:[%s2916_s26 + $0x3c] sm:$0xf] %vm334_vm0, %v307_v15  ;;  %v324_v17 = vld [vmem:[%s2897_s14 + $0x58] sm:$0xf]  ;;  %v325_v18 = vld [vmem:[%s2897_s14 + $0x5c] sm:$0xf]  ;;  %2112 = vmatpush3.bf16.msra.mxu0 %v1984_v16  ;;  %v1985_v30 = vcombine.low %v306_v14, %v307_v15 }
  0xa6   : > { %v308_v19 = vld [vmem:[%s2897_s14 + $0x18] sm:$0xf]  ;;  %357 = vst.msk [vmem:[%s2916_s26 + $0x108] sm:$0xf] %vm334_vm0, %v324_v17  ;;  %358 = vst.msk [vmem:[%s2916_s26 + $0x114] sm:$0xf] %vm334_vm0, %v325_v18  ;;  %2113 = vmatprep.subr.bf16.mxu0 %v1993_v20  ;;  %v1994_v34 = vcombine.low %v324_v17, %v325_v18 }
  0xa7   : > { %v309_v21 = vld [vmem:[%s2897_s14 + $0x1c] sm:$0xf]  ;;  %341 = vst.msk [vmem:[%s2916_s26 + $0x48] sm:$0xf] %vm334_vm0, %v308_v19  ;;  %v326_v22 = vld [vmem:[%s2897_s14 + $0x60] sm:$0xf] }
  0xa8   : > { %v327_v23 = vld [vmem:[%s2897_s14 + $0x64] sm:$0xf]  ;;  %342 = vst.msk [vmem:[%s2916_s26 + $0x54] sm:$0xf] %vm334_vm0, %v309_v21  ;;  %359 = vst.msk [vmem:[%s2916_s26 + $0x120] sm:$0xf] %vm334_vm0, %v326_v22  ;;  %v1986_v41 = vcombine.low %v308_v19, %v309_v21 }
  0xa9   : > { %360 = vst.msk [vmem:[%s2916_s26 + $0x12c] sm:$0xf] %vm334_vm0, %v327_v23  ;;  %v310_v24 = vld [vmem:[%s2897_s14 + $0x20] sm:$0xf]  ;;  %v311_v25 = vld [vmem:[%s2897_s14 + $0x24] sm:$0xf]  ;;  %2114 = vmatpush3.bf16.msra.mxu0 %v1985_v30  ;;  %v1995_v42 = vcombine.low %v326_v22, %v327_v23 }
  0xaa   : > { %v328_v26 = vld [vmem:[%s2897_s14 + $0x68] sm:$0xf]  ;;  %343 = vst.msk [vmem:[%s2916_s26 + $0x60] sm:$0xf] %vm334_vm0, %v310_v24  ;;  %344 = vst.msk [vmem:[%s2916_s26 + $0x6c] sm:$0xf] %vm334_vm0, %v311_v25  ;;  %2115 = vmatprep.subr.bf16.mxu0 %v1994_v34  ;;  %v1987_v43 = vcombine.low %v310_v24, %v311_v25 }
  0xab   : > { %v329_v27 = vld [vmem:[%s2897_s14 + $0x6c] sm:$0xf]  ;;  %361 = vst.msk [vmem:[%s2916_s26 + $0x138] sm:$0xf] %vm334_vm0, %v328_v26  ;;  %v312_v28 = vld [vmem:[%s2897_s14 + $0x28] sm:$0xf] }
  0xac   : > { %v313_v29 = vld [vmem:[%s2897_s14 + $0x2c] sm:$0xf]  ;;  %362 = vst.msk [vmem:[%s2916_s26 + $0x144] sm:$0xf] %vm334_vm0, %v329_v27  ;;  %345 = vst.msk [vmem:[%s2916_s26 + $0x78] sm:$0xf] %vm334_vm0, %v312_v28  ;;  %v1996_v44 = vcombine.low %v328_v26, %v329_v27 }
  0xad   : > { %346 = vst.msk [vmem:[%s2916_s26 + $0x84] sm:$0xf] %vm334_vm0, %v313_v29  ;;  %v330_v31 = vld [vmem:[%s2897_s14 + $0x70] sm:$0xf]  ;;  %v331_v32 = vld [vmem:[%s2897_s14 + $0x74] sm:$0xf]  ;;  %2116 = vmatpush3.bf16.msra.mxu0 %v1986_v41  ;;  %v1988_v46 = vcombine.low %v312_v28, %v313_v29 }
  0xae   : > { %v314_v33 = vld [vmem:[%s2897_s14 + $0x30] sm:$0xf]  ;;  %363 = vst.msk [vmem:[%s2916_s26 + $0x150] sm:$0xf] %vm334_vm0, %v330_v31  ;;  %364 = vst.msk [vmem:[%s2916_s26 + $0x15c] sm:$0xf] %vm334_vm0, %v331_v32  ;;  %2117 = vmatprep.subr.bf16.mxu0 %v1995_v42  ;;  %v1997_v48 = vcombine.low %v330_v31, %v331_v32 }
  0xaf   : > { %v315_v35 = vld [vmem:[%s2897_s14 + $0x34] sm:$0xf]  ;;  %347 = vst.msk [vmem:[%s2916_s26 + $0x90] sm:$0xf] %vm334_vm0, %v314_v33  ;;  %v332_v36 = vld [vmem:[%s2897_s14 + $0x78] sm:$0xf] }
  0xb0   : > { %v333_v37 = vld [vmem:[%s2897_s14 + $0x7c] sm:$0xf]  ;;  %348 = vst.msk [vmem:[%s2916_s26 + $0x9c] sm:$0xf] %vm334_vm0, %v315_v35  ;;  %365 = vst.msk [vmem:[%s2916_s26 + $0x168] sm:$0xf] %vm334_vm0, %v332_v36  ;;  %v1989_v50 = vcombine.low %v314_v33, %v315_v35 }
  0xb1   : > { %366 = vst.msk [vmem:[%s2916_s26 + $0x174] sm:$0xf] %vm334_vm0, %v333_v37  ;;  %v316_v38 = vld [vmem:[%s2897_s14 + $0x38] sm:$0xf]  ;;  %v317_v39 = vld [vmem:[%s2897_s14 + $0x3c] sm:$0xf]  ;;  %2118 = vmatpush3.bf16.msra.mxu0 %v1987_v43  ;;  %v1998_v51 = vcombine.low %v332_v36, %v333_v37 }
  0xb2   : > { %349 = vst.msk [vmem:[%s2916_s26 + $0xa8] sm:$0xf] %vm334_vm0, %v316_v38  ;;  %350 = vst.msk [vmem:[%s2916_s26 + $0xb4] sm:$0xf] %vm334_vm0, %v317_v39  ;;  %v2370_v40 = vld [vmem:[#allocation6 + $0x4] ss:$8 sps:$4 sm:$0xff]   ;;  %2119 = vmatprep.subr.bf16.mxu0 %v1996_v44  ;;  %v1990_v52 = vcombine.low %v316_v38, %v317_v39 }
  0xb3   : > { %591 = vmatprep.mubr.bf16.mxu0 %v2370_v40  ;;  %v2385_v49 = vld [vmem:[#allocation9 + $0x10] sm:$0xff]   ;;  %v2368_v53 = vld [vmem:[#allocation6] ss:$8 sps:$4 sm:$0xff]   ;;  %v2374_v56 = vld [vmem:[#allocation6 + $0x24] ss:$8 sps:$4 sm:$0xff]   ;;  %vm2654_vm1 = vmmov 0  }
  0xb4   : > { %2200 = vmatpush3.bf16.msra.mxu1 %v2385_v49  ;;  %v2371_v54 = vld [vmem:[#allocation6 + $0x14] ss:$8 sps:$4 sm:$0xff]   ;;  %v2373_v55 = vld [vmem:[#allocation6 + $0x10] ss:$8 sps:$4 sm:$0xff]   ;;  %v2376_v57 = vld [vmem:[#allocation6 + $0x20] ss:$8 sps:$4 sm:$0xff]   ;;  %2203 = vmatprep.mubr.msk.bf16.mxu1 %vm2654_vm1, %v2653_v0 }
  0xb5   : > { %2120 = vmatpush3.bf16.msra.mxu0 %v1988_v46  ;;  %2201 = vmatprep.subr.bf16.mxu1 %v2653_v0  ;;  %v2377_v58 = vld [vmem:[#allocation6 + $0x34] ss:$8 sps:$4 sm:$0xff]   ;;  %v2379_v59 = vld [vmem:[#allocation6 + $0x30] ss:$8 sps:$4 sm:$0xff]   ;;  %v2380_v60 = vld [vmem:[#allocation6 + $0x44] ss:$8 sps:$4 sm:$0xff]  }
  0xb6   : > { %2121 = vmatprep.subr.bf16.mxu0 %v1997_v48  ;;  %v2382_v61 = vld [vmem:[#allocation6 + $0x40] ss:$8 sps:$4 sm:$0xff]   ;;  %v2386_v62 = vld [vmem:[#allocation9 + $0x18] sm:$0xff]   ;;  %vm705_vm2 = vcmask 523264   ;;  %v2389_v13 = vld [vmem:[#allocation9 + $0x30] sm:$0xff]   ;;  %v2655_v47 = vmov 0  }
  0xb7   : > { %v2387_v5 = vld [vmem:[#allocation9 + $0x20] sm:$0xff]   ;;  %v2388_v8 = vld [vmem:[#allocation9 + $0x28] sm:$0xff]   ;;  %v2390_v17 = vld [vmem:[#allocation9 + $0x38] sm:$0xff]   ;;  %652 = vst [vmem:[#allocation2 + $0x18] sm:$0xff] %v2655_v47  ;;  %s2656_s16 = smov 64   ;;  %vm844_vm3 = vcmask 1048068  }
  0xb8   : > { %2202 = vmatpush3.bf16.msra.mxu1 %v2386_v62  ;;  %v2391_v22 = vld [vmem:[#allocation9 + $0x40] sm:$0xff]   ;;  %v2392_v27 = vld [vmem:[#allocation9 + $0x48] sm:$0xff]   ;;  %v2393_v32 = vld [vmem:[#allocation9 + $0x50] sm:$0xff]   ;;  %649 = vst [vmem:[#allocation2] sm:$0xff] %v2655_v47  ;;  %vm1065_vm4 = vcmask 1048064   ;;  %vm1068_vm5 = vcmask 1043968  }
  0xb9   : > { %2122 = vmatpush3.bf16.msra.mxu0 %v1989_v50  ;;  %2207 = vmatprep.subr.bf16.mxu1 %v2653_v0  ;;  %v2394_v36 = vld [vmem:[#allocation9 + $0x58] sm:$0xff]   ;;  %v2395_v41 = vld [vmem:[#allocation9 + $0x60] sm:$0xff]   ;;  %v2396_v43 = vld [vmem:[#allocation9 + $0x68] sm:$0xff]   ;;  %654 = vst [vmem:[#allocation2 + $0x28] sm:$0xff] %v2655_v47  ;;  %vm1760_vm6 = vcmask 1047556   ;;  %s2268_s17 = smul.u32 6144, %s2711_s22 }
  0xba   : > { %2123 = vmatprep.subr.bf16.mxu0 %v1998_v51  ;;  %v2397_v44 = vld [vmem:[#allocation9 + $0x70] sm:$0xff]   ;;  %v2398_v45 = vld [vmem:[#allocation9 + $0x78] sm:$0xff]   ;;  %656 = vst [vmem:[#allocation2 + $0x38] sm:$0xff] %v2655_v47  ;;  %658 = vst [vmem:[#allocation2 + $0x48] sm:$0xff] %v2655_v47  ;;  %s1840_s7 = sshll.u32 %s2916_s26, 4  ;;  %s1827_s28 = scalar_lea.sflag [#allocation5], %s2893_s30  ;;  %s3321_s7 = int_to_ptr.vmem [resolvable:$true] %s1840_s7 }
  0xbb   : > { %vm3127_vm7 = vmor %vm1760_vm6, %vm1068_vm5  ;;  %s3319_s6 = scalar_lea.hbm %s3379_s5, %s2268_s17  ;;  %s2566_s29 = scalar_lea.vmem %s3321_s7, 6144 }
  0xbc   : > { %p2567_p6 = scmp.ne.s32.totalorder %s3321_s7, %s2566_s29  ;;  %s2657_s15 = smov [#allocation12]  }
  0xbd   : > { %2124 = vmatpush3.bf16.msra.mxu0 %v1990_v52  ;;  %s2570_s8 = sshll.u32 %s2657_s15, 4  ;;  %s2571_s8 = int_to_ptr.vmem [resolvable:$false] %s2570_s8 }
  0xbe   : > { %1214 = vmatprep.subr.bf16.mxu0 %v2655_v47  ;;  %p2568_p10 = pnand %p2567_p6, %p2841_p8  ;;  %s2572_s11 = scalar_lea.vmem %s2571_s8, 12288 }
  0xbf   : > { %p2573_p3 = scmp.lt.s32.totalorder %s3321_s7, %s2571_s8  ;;  %p2574_p7 = scmp.lt.s32.totalorder %s2572_s11, %s2566_s29 }
  0xc0   : > { %592 = vmatmul.mubr.bf16.vlgmr.msra.gmra.mrb[0].mxu0 %v2368_v53  ;;  %p2569_p12 = pneg %p2568_p10 }
  0xc1   : > { %599 = vmatprep.mubr.bf16.mxu0 %v2371_v54  ;;  %p2575_p9 = por %p2574_p7, %p2573_p3 }
  0xc3   : > { %p2576_p13 = pnand %p2575_p9, %p2569_p12 }
  0xc8   : > { %600 = vmatmul.mubr.bf16.gmra.mrb[4].mxu0 %v2373_v55  ;;  %v2005_v55 = vld [vmem:[#allocation11 + $0x1] ss:$0 sm:$0xff] }
  0xc9   : > { %607 = vmatprep.mubr.bf16.mxu0 %v2374_v56 }
  0xd0   : > { %608 = vmatmul.mubr.bf16.gmra.mrb[8].mxu0 %v2376_v57 }
  0xd1   : > { %615 = vmatprep.mubr.bf16.mxu0 %v2377_v58 }
  0xd8   : > { %616 = vmatmul.mubr.bf16.gmra.mrb[12].mxu0 %v2379_v59 }
  0xd9   : > { %623 = vmatprep.mubr.bf16.mxu0 %v2380_v60 }
  0xe0   : > { %624 = vmatmul.mubr.bf16.gmra.mrb[16].mxu0 %v2382_v61 }
 0x193   : > { %v2125_v63 = vpop.f32.mrb[0].mxu0 }
 0x194   : > { %v2126_v1 = vpop.f32.mrb[1].mxu0 }
 0x195   : > { %v2127_v2 = vadd.f32 %v2126_v1, %v2125_v63  ;;  %v2128_v3 = vpop.f32.mrb[2].mxu0  ;;  %v2011_v1 = vld [vmem:[#allocation11 + $0x2] ss:$0 sm:$0xff] }
 0x196   : > { %v2129_v4 = vpop.f32.mrb[3].mxu0 }
 0x197   : > { %v665_v6 = vpack.c.bf16 %v2127_v2, %v2127_v2  ;;  %v2130_v7 = vadd.f32 %v2129_v4, %v2128_v3 }
 0x199   : > { %2204 = vmatmul.mubr.msk.bf16.vlgmr.msra.gmra.mrb[0].mxu1 %vm705_vm2, %v665_v6  ;;  %v752_v24 = vpack.c.bf16 %v2130_v7, %v2130_v7 }
 0x19a   : > { %2208 = vmatpush3.bf16.msra.mxu1 %v2387_v5  ;;  %2215 = vmatprep.mubr.msk.bf16.mxu1 %vm2654_vm1, %v2653_v0 }
 0x19b   : > { %2209 = vmatprep.subr.bf16.mxu1 %v2653_v0  ;;  %v2131_v9 = vpop.f32.mrb[4].mxu0 }
 0x19c   : > { %v2132_v10 = vpop.f32.mrb[5].mxu0 }
 0x19d   : > { %v2133_v11 = vadd.f32 %v2132_v10, %v2131_v9  ;;  %v2134_v12 = vpop.f32.mrb[6].mxu0 }
 0x19e   : > { %2210 = vmatpush3.bf16.msra.mxu1 %v2388_v8  ;;  %v2135_v14 = vpop.f32.mrb[7].mxu0 }
 0x19f   : > { %2211 = vmatprep.subr.bf16.mxu1 %v2653_v0  ;;  %v2136_v15 = vadd.f32 %v2135_v14, %v2134_v12 }
 0x1a1   : > { %v846_v16 = vpack.c.bf16 %v2136_v15, %v2133_v11  ;;  %v2017_v11 = vld [vmem:[#allocation11 + $0x3] ss:$0 sm:$0xff] }
 0x1a2   : > { %2212 = vmatpush3.bf16.msra.mxu1 %v2389_v13 }
 0x1a3   : > { %2213 = vmatprep.subr.bf16.mxu1 %v2653_v0  ;;  %v2137_v18 = vpop.f32.mrb[8].mxu0 }
 0x1a4   : > { %v2138_v19 = vpop.f32.mrb[9].mxu0 }
 0x1a5   : > { %v2139_v20 = vadd.f32 %v2138_v19, %v2137_v18  ;;  %v2140_v21 = vpop.f32.mrb[10].mxu0  ;;  %v2399_v18 = vld [vmem:[#allocation6 + $0x54] ss:$8 sps:$4 sm:$0xff]  }
 0x1a6   : > { %2214 = vmatpush3.bf16.msra.mxu1 %v2390_v17  ;;  %v2141_v23 = vpop.f32.mrb[11].mxu0  ;;  %630 = vmatprep.mubr.bf16.mxu0 %v2399_v18 }
 0x1a7   : > { %2219 = vmatprep.subr.bf16.mxu1 %v2653_v0  ;;  %v2142_v25 = vadd.f32 %v2141_v23, %v2140_v21  ;;  %v2401_v21 = vld [vmem:[#allocation6 + $0x50] ss:$8 sps:$4 sm:$0xff]  }
 0x1a8   : > { %631 = vmatmul.mubr.bf16.gmra.mrb[20].mxu0 %v2401_v21 }
 0x1a9   : > { %2216 = vmatmul.mubr.msk.bf16.vlgmr.msra.gmra.mrb[4].mxu1 %vm705_vm2, %v752_v24  ;;  %v936_v26 = vpack.c.bf16 %v2142_v25, %v2139_v20 }
 0x1aa   : > { %2220 = vmatpush3.bf16.msra.mxu1 %v2391_v22  ;;  %2227 = vmatprep.mubr.msk.bf16.mxu1 %vm2654_vm1, %v2653_v0 }
 0x1ab   : > { %2221 = vmatprep.subr.bf16.mxu1 %v2653_v0  ;;  %v2143_v28 = vpop.f32.mrb[12].mxu0 }
 0x1ac   : > { %v2144_v29 = vpop.f32.mrb[13].mxu0 }
 0x1ad   : > { %v2145_v30 = vadd.f32 %v2144_v29, %v2143_v28  ;;  %v2146_v31 = vpop.f32.mrb[14].mxu0  ;;  %v2402_v29 = vld [vmem:[#allocation6 + $0x64] ss:$8 sps:$4 sm:$0xff]  }
 0x1ae   : > { %2222 = vmatpush3.bf16.msra.mxu1 %v2392_v27  ;;  %v2147_v33 = vpop.f32.mrb[15].mxu0  ;;  %636 = vmatprep.mubr.bf16.mxu0 %v2402_v29 }
 0x1af   : > { %2223 = vmatprep.subr.bf16.mxu1 %v2653_v0  ;;  %v2148_v34 = vadd.f32 %v2147_v33, %v2146_v31 }
 0x1b1   : > { %v937_v35 = vpack.c.bf16 %v2148_v34, %v2145_v30 }
 0x1b2   : > { %2224 = vmatpush3.bf16.msra.mxu1 %v2393_v32  ;;  %v2404_v32 = vld [vmem:[#allocation6 + $0x60] ss:$8 sps:$4 sm:$0xff]  }
 0x1b3   : > { %2225 = vmatprep.subr.bf16.mxu1 %v2653_v0  ;;  %v2149_v37 = vpop.f32.mrb[16].mxu0  ;;  %637 = vmatmul.mubr.bf16.gmra.mrb[24].mxu0 %v2404_v32 }
 0x1b4   : > { %v2150_v38 = vpop.f32.mrb[17].mxu0 }
 0x1b5   : > { %v2151_v39 = vadd.f32 %v2150_v38, %v2149_v37  ;;  %v2152_v40 = vpop.f32.mrb[18].mxu0 }
 0x1b6   : > { %2226 = vmatpush3.bf16.msra.mxu1 %v2394_v36  ;;  %v2153_v42 = vpop.f32.mrb[19].mxu0  ;;  %v2405_v40 = vld [vmem:[#allocation6 + $0x74] ss:$8 sps:$4 sm:$0xff]  }
 0x1b7   : > { %2231 = vmatprep.subr.bf16.mxu1 %v2653_v0  ;;  %v938_v46 = vpack.c.bf16 %v2151_v39, %v2151_v39  ;;  %v2407_v42 = vld [vmem:[#allocation6 + $0x70] ss:$8 sps:$4 sm:$0xff]   ;;  %642 = vmatprep.mubr.bf16.mxu0 %v2405_v40 }
 0x1b9   : > { %2228 = vmatmul.mubr.msk.bf16.vlgmr.msra.gmra.mrb[8].mxu1 %vm705_vm2, %v846_v16 }
 0x1ba   : > { %2232 = vmatpush3.bf16.msra.mxu1 %v2395_v41  ;;  %2239 = vmatprep.mubr.msk.bf16.mxu1 %vm2654_vm1, %v2653_v0 }
 0x1bb   : > { %2233 = vmatprep.subr.bf16.mxu1 %v2653_v0  ;;  %643 = vmatmul.mubr.bf16.gmra.mrb[28].mxu0 %v2407_v42 }
 0x1bc   : > { %1246 = vmatprep.mubr.bf16.mxu0 %v2655_v47 }
 0x1be   : > { %2234 = vmatpush3.bf16.msra.mxu1 %v2396_v43 }
 0x1bf   : > { %2235 = vmatprep.subr.bf16.mxu1 %v2653_v0 }
 0x1c2   : > { %2236 = vmatpush3.bf16.msra.mxu1 %v2397_v44 }
 0x1c3   : > { %2237 = vmatprep.subr.bf16.mxu1 %v2653_v0 }
 0x1c6   : > { %2238 = vmatpush3.bf16.msra.mxu1 %v2398_v45 }
 0x1c7   : > { %2251 = vmatprep.subr.bf16.mxu1 %v2655_v47 }
 0x1c9   : > { %2240 = vmatmul.mubr.msk.bf16.vlgmr.msra.gmra.mrb[12].mxu1 %vm705_vm2, %v936_v26 }
 0x1ca   : > { %2243 = vmatprep.mubr.msk.bf16.mxu1 %vm2654_vm1, %v2653_v0 }
 0x1d1   : > { %2244 = vmatmul.mubr.msk.bf16.gmra.mrb[16].mxu1 %vm705_vm2, %v937_v35 }
 0x1d2   : > { %2247 = vmatprep.mubr.msk.bf16.mxu1 %vm2654_vm1, %v2653_v0  ;;  %v1999_v0 = vld [vmem:[#allocation11] ss:$0 sm:$0xff] }
 0x1d9   : > { %2248 = vmatmul.mubr.msk.bf16.gmra.mrb[20].mxu1 %vm705_vm2, %v938_v46 }
 0x1da   : > { %1326 = vmatprep.mubr.bf16.mxu1 %v2655_v47 }
 0x26c   : > { %v743_v48 = vpop.f32.mrb[0].mxu1 }
 0x26d   : > { %v744_v49 = vadd.f32 %v1999_v0, %v743_v48  ;;  %v2205_v50 = vpop.f32.mrb[1].mxu1 }
 0x26e   : > { %v746_v51 = vpop.f32.mrb[2].mxu1 }
 0x26f   : > { %v749_v52 = vmax.f32 %v744_v49, 0.0  ;;  %v2206_v53 = vpop.f32.mrb[3].mxu1 }
 0x270   : > { %v2409_v53 = vld [vmem:[#allocation8 + $0x40] sm:$0xff]  }
 0x271   : > { %v750_v54 = vpack.c.bf16 %v749_v52, %v749_v52  ;;  %v2408_v52 = vld [vmem:[#allocation8] sm:$0xff]  }
 0x273   : > { %751 = vst.msk [vmem:[#allocation2] sm:$0xf] %vm334_vm0, %v750_v54  ;;  %v2410_v54 = vld [vmem:[#allocation8 + $0x8] sm:$0xff]  }
 0x27c   : > { %v831_v56 = vpop.f32.mrb[4].mxu1 }
 0x27d   : > { %v832_v57 = vadd.f32 %v2005_v55, %v831_v56  ;;  %v2217_v58 = vpop.f32.mrb[5].mxu1  ;;  %v2411_v55 = vld [vmem:[#allocation8 + $0x48] sm:$0xff]   ;;  %v2412_v56 = vld [vmem:[#allocation8 + $0x10] sm:$0xff]  }
 0x27e   : > { %v834_v59 = vpop.f32.mrb[6].mxu1  ;;  %v2414_v58 = vld [vmem:[#allocation8 + $0x18] sm:$0xff]  }
 0x27f   : > { %v837_v60 = vmax.f32 %v832_v57, 0.0  ;;  %v2218_v61 = vpop.f32.mrb[7].mxu1  ;;  %v2413_v57 = vld [vmem:[#allocation8 + $0x50] sm:$0xff]   ;;  %v2415_v59 = vld [vmem:[#allocation8 + $0x58] sm:$0xff]  }
 0x280   : > { %v2417_v61 = vld [vmem:[#allocation8 + $0x60] sm:$0xff]  }
 0x281   : > { %v838_v62 = vpack.c.bf16 %v837_v60, %v837_v60  ;;  %v2416_v60 = vld [vmem:[#allocation8 + $0x20] sm:$0xff]  }
 0x283   : > { %v840_v63 = vrot.slane %v838_v62, 4  ;;  %v2418_v62 = vld [vmem:[#allocation8 + $0x28] sm:$0xff]  }
 0x285   : > { %841 = vrot.lane.b32.xlu0 %v840_v63, %s2656_s16  ;;  %v2419_v63 = vld [vmem:[#allocation8 + $0x68] sm:$0xff]  }
 0x28c   : > { %v925_v2 = vpop.f32.mrb[8].mxu1 }
 0x28d   : > { %v926_v3 = vadd.f32 %v2011_v1, %v925_v2  ;;  %v2229_v4 = vpop.f32.mrb[9].mxu1  ;;  %v2421_v2 = vld [vmem:[#allocation8 + $0x70] sm:$0xff]  }
 0x28e   : > { %v928_v5 = vpop.f32.mrb[10].mxu1  ;;  %v2423_v4 = vld [vmem:[#allocation8 + $0x78] sm:$0xff]  }
 0x28f   : > { %v929_v6 = vadd.f32 %v2011_v1, %v928_v5  ;;  %v2230_v7 = vpop.f32.mrb[11].mxu1  ;;  %v932_v8 = vmax.f32 %v926_v3, 0.0  ;;  %v2420_v1 = vld [vmem:[#allocation8 + $0x30] sm:$0xff]   ;;  %v2422_v3 = vld [vmem:[#allocation8 + $0x38] sm:$0xff]   ;;  %v2155_v5 = vpop.f32.mrb[20].mxu0 }
 0x291   : > { %v933_v9 = vmax.f32 %v929_v6, 0.0  ;;  %v2156_v6 = vpop.f32.mrb[21].mxu0 }
 0x292   : > { %v2158_v7 = vpop.f32.mrb[22].mxu0 }
 0x293   : > { %v934_v10 = vpack.c.bf16 %v933_v9, %v932_v8  ;;  %v2159_v8 = vpop.f32.mrb[23].mxu0 }
 0x294   : > { %v2161_v9 = vpop.f32.mrb[24].mxu0 }
 0x295   : > { %935 = vst.msk [vmem:[#allocation2 + $0x18] sm:$0xff] %vm705_vm2, %v934_v10  ;;  %v2162_v10 = vpop.f32.mrb[25].mxu0 }
 0x29c   : > { %v1023_v12 = vpop.f32.mrb[12].mxu1  ;;  %v1105_v45 = vld [vmem:[#allocation2 + $0x18] sm:$0xff] }
 0x29d   : > { %v1024_v13 = vadd.f32 %v2017_v11, %v1023_v12  ;;  %v2241_v14 = vpop.f32.mrb[13].mxu1 }
 0x29e   : > { %v1026_v15 = vpop.f32.mrb[14].mxu1 }
 0x29f   : > { %v1027_v16 = vadd.f32 %v2017_v11, %v1026_v15  ;;  %v2242_v17 = vpop.f32.mrb[15].mxu1  ;;  %v1045_v19 = vmax.f32 %v1024_v13, 0.0 }
 0x2a1   : > { %v1046_v20 = vmax.f32 %v1027_v16, 0.0 }
 0x2a3   : > { %v1050_v22 = vpack.c.bf16 %v1046_v20, %v1045_v19 }
 0x2a4   : > { %v1031_v23 = vpop.f32.mrb[16].mxu1 }
 0x2a5   : > { %v1032_v24 = vadd.f32 %v2017_v11, %v1031_v23  ;;  %1056 = vrot.lane.b32.xlu0 %v1050_v22, %s2656_s16  ;;  %v2245_v25 = vpop.f32.mrb[17].mxu1 }
 0x2a6   : > { %v1034_v26 = vpop.f32.mrb[18].mxu1 }
 0x2a7   : > { %v1035_v27 = vadd.f32 %v2017_v11, %v1034_v26  ;;  %v2246_v28 = vpop.f32.mrb[19].mxu1  ;;  %v1047_v30 = vmax.f32 %v1032_v24, 0.0 }
 0x2a9   : > { %v1048_v31 = vmax.f32 %v1035_v27, 0.0 }
 0x2ab   : > { %v1051_v33 = vpack.c.bf16 %v1048_v31, %v1047_v30 }
 0x2ac   : > { %v1039_v34 = vpop.f32.mrb[20].mxu1 }
 0x2ad   : > { %v1040_v35 = vadd.f32 %v2017_v11, %v1039_v34  ;;  %1058 = vrot.lane.b32.xlu1 %v1051_v33, %s2656_s16  ;;  %v2249_v36 = vpop.f32.mrb[21].mxu1  ;;  %v2164_v11 = vpop.f32.mrb[26].mxu0 }
 0x2ae   : > { %v1042_v37 = vpop.f32.mrb[22].mxu1  ;;  %v2165_v12 = vpop.f32.mrb[27].mxu0 }
 0x2af   : > { %v1049_v38 = vmax.f32 %v1040_v35, 0.0  ;;  %v2250_v39 = vpop.f32.mrb[23].mxu1  ;;  %v2167_v13 = vpop.f32.mrb[28].mxu0 }
 0x2b0   : > { %v2168_v14 = vpop.f32.mrb[29].mxu0 }
 0x2b1   : > { %v1052_v41 = vpack.c.bf16 %v1049_v38, %v1049_v38  ;;  %v2170_v15 = vpop.f32.mrb[30].mxu0 }
 0x2b2   : > { %v2171_v16 = vpop.f32.mrb[31].mxu0 }
 0x2b3   : > { %1060 = vrot.lane.b32.xlu1 %v1052_v41, %s2656_s16 }
 0x2f7   : > { %v842_v43 = vpop.permute.xlu0 %841 }
 0x2f8   : > { %845 = vst.msk [vmem:[#allocation2] sm:$0xf0] %vm844_vm3, %v842_v43 }
 0x2ff   : > { %v1102_v44 = vld [vmem:[#allocation2] sm:$0xff] }
 0x300   : > { %1215 = vmatpush1.bf16.msra.mxu0 %v1102_v44  ;;  %2259 = vmatpush1.bf16.msra.mxu1 %v1102_v44 }
 0x301   : > { %1216 = vmatprep.subr.bf16.mxu0 %v1105_v45  ;;  %2252 = vmatprep.subr.bf16.mxu1 %v1105_v45 }
 0x304   : > { %1217 = vmatpush1.bf16.msra.mxu0 %v2655_v47  ;;  %2260 = vmatpush1.bf16.msra.mxu1 %v2655_v47 }
 0x317   : > { %v1057_v46 = vpop.permute.xlu0 %1056 }
 0x318   : > { %1066 = vst.msk [vmem:[#allocation2 + $0x28] sm:$0xff] %vm1065_vm4, %v1057_v46 }
 0x31f   : > { %v1059_v0 = vpop.permute.xlu1 %1058  ;;  %v1107_v48 = vld [vmem:[#allocation2 + $0x28] sm:$0xff] }
 0x320   : > { %1067 = vst.msk [vmem:[#allocation2 + $0x38] sm:$0xff] %vm1065_vm4, %v1059_v0  ;;  %1218 = vmatprep.subr.bf16.mxu0 %v1107_v48  ;;  %2253 = vmatprep.subr.bf16.mxu1 %v1107_v48 }
 0x321   : > { %1219 = vmatpush1.bf16.msra.mxu0 %v2655_v47  ;;  %2261 = vmatpush1.bf16.msra.mxu1 %v2655_v47 }
 0x325   : > { %v1061_v49 = vpop.permute.xlu1 %1060 }
 0x326   : > { %1069 = vst.msk [vmem:[#allocation2 + $0x48] sm:$0xf] %vm1068_vm5, %v1061_v49 }
 0x327   : > { %v1109_v50 = vld [vmem:[#allocation2 + $0x38] sm:$0xff] }
 0x328   : > { %1220 = vmatprep.subr.bf16.mxu0 %v1109_v50  ;;  %2254 = vmatprep.subr.bf16.mxu1 %v1109_v50 }
 0x329   : > { %1221 = vmatpush1.bf16.msra.mxu0 %v2655_v47  ;;  %2262 = vmatpush1.bf16.msra.mxu1 %v2655_v47 }
 0x32d   : > { %v1111_v51 = vld [vmem:[#allocation2 + $0x48] sm:$0xff] }
 0x32e   : > { %1222 = vmatprep.subr.bf16.mxu0 %v1111_v51  ;;  %2255 = vmatprep.subr.bf16.mxu1 %v1111_v51 }
 0x32f   : > { %1223 = vmatpush1.bf16.msra.mxu0 %v2655_v47  ;;  %2263 = vmatpush1.bf16.msra.mxu1 %v2655_v47 }
 0x330   : > { %1224 = vmatprep.subr.bf16.mxu0 %v2655_v47  ;;  %2256 = vmatprep.subr.bf16.mxu1 %v2655_v47 }
 0x333   : > { %1225 = vmatpush1.bf16.msra.mxu0 %v2655_v47  ;;  %2264 = vmatpush1.bf16.msra.mxu1 %v2655_v47 }
 0x334   : > { %1226 = vmatprep.subr.bf16.mxu0 %v2655_v47  ;;  %2257 = vmatprep.subr.bf16.mxu1 %v2655_v47 }
 0x337   : > { %1227 = vmatpush1.bf16.msra.mxu0 %v2655_v47  ;;  %2265 = vmatpush1.bf16.msra.mxu1 %v2655_v47 }
 0x338   : > { %1228 = vmatprep.subr.bf16.mxu0 %v2655_v47  ;;  %2258 = vmatprep.subr.bf16.mxu1 %v2655_v47 }
 0x33b   : > { %1229 = vmatpush1.bf16.msra.mxu0 %v2655_v47  ;;  %2266 = vmatpush1.bf16.msra.mxu1 %v2655_v47 }
 0x33e   : > { %1247 = vmatmul.mubr.bf16.vlgmr.msra.gmra.mrb[32].mxu0 %v2408_v52  ;;  %1327 = vmatmul.mubr.bf16.vlgmr.msra.gmra.mrb[24].mxu1 %v2409_v53 }
 0x33f   : > { %1256 = vmatprep.mubr.bf16.mxu0 %v2655_v47  ;;  %1336 = vmatprep.mubr.bf16.mxu1 %v2655_v47 }
 0x346   : > { %1257 = vmatmul.mubr.bf16.gmra.mrb[36].mxu0 %v2410_v54  ;;  %1337 = vmatmul.mubr.bf16.gmra.mrb[28].mxu1 %v2411_v55 }
 0x347   : > { %1266 = vmatprep.mubr.bf16.mxu0 %v2655_v47  ;;  %1346 = vmatprep.mubr.bf16.mxu1 %v2655_v47 }
 0x34e   : > { %1267 = vmatmul.mubr.bf16.gmra.mrb[40].mxu0 %v2412_v56  ;;  %1347 = vmatmul.mubr.bf16.gmra.mrb[32].mxu1 %v2413_v57 }
 0x34f   : > { %1276 = vmatprep.mubr.bf16.mxu0 %v2655_v47  ;;  %1356 = vmatprep.mubr.bf16.mxu1 %v2655_v47 }
 0x356   : > { %1277 = vmatmul.mubr.bf16.gmra.mrb[44].mxu0 %v2414_v58  ;;  %1357 = vmatmul.mubr.bf16.gmra.mrb[36].mxu1 %v2415_v59 }
 0x357   : > { %1286 = vmatprep.mubr.bf16.mxu0 %v2655_v47  ;;  %1366 = vmatprep.mubr.bf16.mxu1 %v2655_v47 }
 0x35e   : > { %1287 = vmatmul.mubr.bf16.gmra.mrb[48].mxu0 %v2416_v60  ;;  %1367 = vmatmul.mubr.bf16.gmra.mrb[40].mxu1 %v2417_v61 }
 0x35f   : > { %1296 = vmatprep.mubr.bf16.mxu0 %v2655_v47  ;;  %1376 = vmatprep.mubr.bf16.mxu1 %v2655_v47 }
 0x366   : > { %1297 = vmatmul.mubr.bf16.gmra.mrb[52].mxu0 %v2418_v62  ;;  %1377 = vmatmul.mubr.bf16.gmra.mrb[44].mxu1 %v2419_v63 }
 0x367   : > { %1306 = vmatprep.mubr.bf16.mxu0 %v2655_v47  ;;  %1386 = vmatprep.mubr.bf16.mxu1 %v2655_v47 }
 0x36e   : > { %1307 = vmatmul.mubr.bf16.gmra.mrb[56].mxu0 %v2420_v1  ;;  %1387 = vmatmul.mubr.bf16.gmra.mrb[48].mxu1 %v2421_v2 }
 0x36f   : > { %1316 = vmatprep.mubr.bf16.mxu0 %v2655_v47  ;;  %1396 = vmatprep.mubr.bf16.mxu1 %v2655_v47 }
 0x376   : > { %1317 = vmatmul.mubr.bf16.gmra.mrb[60].mxu0 %v2422_v3  ;;  %1397 = vmatmul.mubr.bf16.gmra.mrb[52].mxu1 %v2423_v4 }
 0x411   : > { %v1248_v17 = vpop.f32.mrb[32].mxu0  ;;  %v1328_v18 = vpop.f32.mrb[24].mxu1 }
 0x412   : > { %v1250_v19 = vpop.f32.mrb[33].mxu0  ;;  %v1330_v47 = vpop.f32.mrb[25].mxu1 }
 0x413   : > { %v2077_v20 = vpack.c.bf16 %v1250_v19, %v1248_v17  ;;  %v1252_v21 = vpop.f32.mrb[34].mxu0  ;;  %v2093_v22 = vpack.c.bf16 %v1330_v47, %v1328_v18  ;;  %v1332_v23 = vpop.f32.mrb[26].mxu1 }
 0x414   : > { %v1254_v24 = vpop.f32.mrb[35].mxu0  ;;  %v1334_v25 = vpop.f32.mrb[27].mxu1 }
 0x415   : > { %v2078_v26 = vpack.c.bf16 %v1254_v24, %v1252_v21  ;;  %1567 = vrot.lane.b32.xlu0 %v2077_v20, %s2656_s16  ;;  %v2094_v27 = vpack.c.bf16 %v1334_v25, %v1332_v23 }
 0x417   : > { %1569 = vrot.lane.b32.xlu1 %v2078_v26, %s2656_s16 }
 0x419   : > { %v1258_v28 = vpop.f32.mrb[36].mxu0  ;;  %1599 = vrot.lane.b32.xlu0 %v2093_v22, %s2656_s16  ;;  %v1338_v29 = vpop.f32.mrb[28].mxu1 }
 0x41a   : > { %v1260_v30 = vpop.f32.mrb[37].mxu0  ;;  %v1340_v31 = vpop.f32.mrb[29].mxu1 }
 0x41b   : > { %v2079_v32 = vpack.c.bf16 %v1260_v30, %v1258_v28  ;;  %v1262_v33 = vpop.f32.mrb[38].mxu0  ;;  %1601 = vrot.lane.b32.xlu1 %v2094_v27, %s2656_s16  ;;  %v2095_v34 = vpack.c.bf16 %v1340_v31, %v1338_v29  ;;  %v1342_v35 = vpop.f32.mrb[30].mxu1 }
 0x41c   : > { %v1264_v36 = vpop.f32.mrb[39].mxu0  ;;  %v1344_v37 = vpop.f32.mrb[31].mxu1 }
 0x41d   : > { %v2080_v38 = vpack.c.bf16 %v1264_v36, %v1262_v33  ;;  %1571 = vrot.lane.b32.xlu0 %v2079_v32, %s2656_s16  ;;  %v2096_v39 = vpack.c.bf16 %v1344_v37, %v1342_v35 }
 0x41f   : > { %1573 = vrot.lane.b32.xlu1 %v2080_v38, %s2656_s16 }
 0x421   : > { %v1268_v40 = vpop.f32.mrb[40].mxu0  ;;  %1603 = vrot.lane.b32.xlu0 %v2095_v34, %s2656_s16  ;;  %v1348_v41 = vpop.f32.mrb[32].mxu1 }
 0x422   : > { %v1270_v42 = vpop.f32.mrb[41].mxu0  ;;  %v1350_v43 = vpop.f32.mrb[33].mxu1 }
 0x423   : > { %v2081_v44 = vpack.c.bf16 %v1270_v42, %v1268_v40  ;;  %v1272_v45 = vpop.f32.mrb[42].mxu0  ;;  %1605 = vrot.lane.b32.xlu1 %v2096_v39, %s2656_s16  ;;  %v2097_v46 = vpack.c.bf16 %v1350_v43, %v1348_v41  ;;  %v1352_v0 = vpop.f32.mrb[34].mxu1 }
 0x424   : > { %v1274_v48 = vpop.f32.mrb[43].mxu0  ;;  %v1354_v49 = vpop.f32.mrb[35].mxu1 }
 0x425   : > { %v2082_v50 = vpack.c.bf16 %v1274_v48, %v1272_v45  ;;  %1575 = vrot.lane.b32.xlu0 %v2081_v44, %s2656_s16  ;;  %v2098_v51 = vpack.c.bf16 %v1354_v49, %v1352_v0 }
 0x427   : > { %1577 = vrot.lane.b32.xlu1 %v2082_v50, %s2656_s16 }
 0x429   : > { %v1278_v52 = vpop.f32.mrb[44].mxu0  ;;  %1607 = vrot.lane.b32.xlu0 %v2097_v46, %s2656_s16  ;;  %v1358_v53 = vpop.f32.mrb[36].mxu1 }
 0x42a   : > { %v1280_v54 = vpop.f32.mrb[45].mxu0  ;;  %v1360_v55 = vpop.f32.mrb[37].mxu1 }
 0x42b   : > { %v2083_v56 = vpack.c.bf16 %v1280_v54, %v1278_v52  ;;  %v1282_v57 = vpop.f32.mrb[46].mxu0  ;;  %1609 = vrot.lane.b32.xlu1 %v2098_v51, %s2656_s16  ;;  %v2099_v58 = vpack.c.bf16 %v1360_v55, %v1358_v53  ;;  %v1362_v59 = vpop.f32.mrb[38].mxu1 }
 0x42c   : > { %v1284_v60 = vpop.f32.mrb[47].mxu0  ;;  %v1364_v61 = vpop.f32.mrb[39].mxu1 }
 0x42d   : > { %v2084_v62 = vpack.c.bf16 %v1284_v60, %v1282_v57  ;;  %1579 = vrot.lane.b32.xlu0 %v2083_v56, %s2656_s16  ;;  %v2100_v63 = vpack.c.bf16 %v1364_v61, %v1362_v59 }
 0x42f   : > { %1581 = vrot.lane.b32.xlu1 %v2084_v62, %s2656_s16 }
 0x431   : > { %v1288_v1 = vpop.f32.mrb[48].mxu0  ;;  %1611 = vrot.lane.b32.xlu0 %v2099_v58, %s2656_s16  ;;  %v1368_v2 = vpop.f32.mrb[40].mxu1 }
 0x432   : > { %v1290_v3 = vpop.f32.mrb[49].mxu0  ;;  %v1370_v4 = vpop.f32.mrb[41].mxu1 }
 0x433   : > { %v2085_v5 = vpack.c.bf16 %v1290_v3, %v1288_v1  ;;  %v1292_v6 = vpop.f32.mrb[50].mxu0  ;;  %1613 = vrot.lane.b32.xlu1 %v2100_v63, %s2656_s16  ;;  %v2101_v7 = vpack.c.bf16 %v1370_v4, %v1368_v2  ;;  %v1372_v8 = vpop.f32.mrb[42].mxu1 }
 0x434   : > { %v1294_v9 = vpop.f32.mrb[51].mxu0  ;;  %v1374_v10 = vpop.f32.mrb[43].mxu1 }
 0x435   : > { %v2086_v11 = vpack.c.bf16 %v1294_v9, %v1292_v6  ;;  %1583 = vrot.lane.b32.xlu0 %v2085_v5, %s2656_s16  ;;  %v2102_v12 = vpack.c.bf16 %v1374_v10, %v1372_v8 }
 0x437   : > { %1585 = vrot.lane.b32.xlu1 %v2086_v11, %s2656_s16 }
 0x439   : > { %v1298_v13 = vpop.f32.mrb[52].mxu0  ;;  %1615 = vrot.lane.b32.xlu0 %v2101_v7, %s2656_s16  ;;  %v1378_v14 = vpop.f32.mrb[44].mxu1 }
 0x43a   : > { %v1300_v15 = vpop.f32.mrb[53].mxu0  ;;  %v1380_v16 = vpop.f32.mrb[45].mxu1 }
 0x43b   : > { %v2087_v17 = vpack.c.bf16 %v1300_v15, %v1298_v13  ;;  %v1302_v18 = vpop.f32.mrb[54].mxu0  ;;  %1617 = vrot.lane.b32.xlu1 %v2102_v12, %s2656_s16  ;;  %v2103_v19 = vpack.c.bf16 %v1380_v16, %v1378_v14  ;;  %v1382_v47 = vpop.f32.mrb[46].mxu1 }
 0x43c   : > { %v1304_v20 = vpop.f32.mrb[55].mxu0  ;;  %v1384_v21 = vpop.f32.mrb[47].mxu1 }
 0x43d   : > { %v2088_v22 = vpack.c.bf16 %v1304_v20, %v1302_v18  ;;  %1587 = vrot.lane.b32.xlu0 %v2087_v17, %s2656_s16  ;;  %v2104_v23 = vpack.c.bf16 %v1384_v21, %v1382_v47 }
 0x43f   : > { %1589 = vrot.lane.b32.xlu1 %v2088_v22, %s2656_s16 }
 0x441   : > { %v1308_v24 = vpop.f32.mrb[56].mxu0  ;;  %1619 = vrot.lane.b32.xlu0 %v2103_v19, %s2656_s16  ;;  %v1388_v25 = vpop.f32.mrb[48].mxu1 }
 0x442   : > { %v1310_v26 = vpop.f32.mrb[57].mxu0  ;;  %v1390_v27 = vpop.f32.mrb[49].mxu1 }
 0x443   : > { %v2089_v28 = vpack.c.bf16 %v1310_v26, %v1308_v24  ;;  %v1312_v29 = vpop.f32.mrb[58].mxu0  ;;  %1621 = vrot.lane.b32.xlu1 %v2104_v23, %s2656_s16  ;;  %v2105_v30 = vpack.c.bf16 %v1390_v27, %v1388_v25  ;;  %v1392_v31 = vpop.f32.mrb[50].mxu1 }
 0x444   : > { %v1314_v32 = vpop.f32.mrb[59].mxu0  ;;  %v1394_v33 = vpop.f32.mrb[51].mxu1 }
 0x445   : > { %v2090_v34 = vpack.c.bf16 %v1314_v32, %v1312_v29  ;;  %1591 = vrot.lane.b32.xlu0 %v2089_v28, %s2656_s16  ;;  %v2106_v35 = vpack.c.bf16 %v1394_v33, %v1392_v31 }
 0x447   : > { %1593 = vrot.lane.b32.xlu1 %v2090_v34, %s2656_s16 }
 0x449   : > { %v1318_v36 = vpop.f32.mrb[60].mxu0  ;;  %1623 = vrot.lane.b32.xlu0 %v2105_v30, %s2656_s16  ;;  %v1398_v37 = vpop.f32.mrb[52].mxu1 }
 0x44a   : > { %v1320_v38 = vpop.f32.mrb[61].mxu0  ;;  %v1400_v39 = vpop.f32.mrb[53].mxu1 }
 0x44b   : > { %v2091_v40 = vpack.c.bf16 %v1320_v38, %v1318_v36  ;;  %v1322_v41 = vpop.f32.mrb[62].mxu0  ;;  %1625 = vrot.lane.b32.xlu1 %v2106_v35, %s2656_s16  ;;  %v2107_v42 = vpack.c.bf16 %v1400_v39, %v1398_v37  ;;  %v1402_v43 = vpop.f32.mrb[54].mxu1 }
 0x44c   : > { %v1324_v44 = vpop.f32.mrb[63].mxu0  ;;  %v1404_v45 = vpop.f32.mrb[55].mxu1 }
 0x44d   : > { %v2092_v46 = vpack.c.bf16 %v1324_v44, %v1322_v41  ;;  %1595 = vrot.lane.b32.xlu0 %v2091_v40, %s2656_s16  ;;  %v2108_v0 = vpack.c.bf16 %v1404_v45, %v1402_v43 }
 0x44f   : > { %1597 = vrot.lane.b32.xlu1 %v2092_v46, %s2656_s16 }
 0x451   : > { %1627 = vrot.lane.b32.xlu0 %v2107_v42, %s2656_s16 }
 0x453   : > { %1629 = vrot.lane.b32.xlu1 %v2108_v0, %s2656_s16 }
 0x487   : > { %v1568_v48 = vpop.permute.xlu0 %1567 }
 0x488   : > { %v1631_v50 = vrot.slane %v1568_v48, 4 }
 0x489   : > { %v1570_v51 = vpop.permute.xlu1 %1569 }
 0x48a   : > { %v1664_v52 = vsel %vm705_vm2, %v1631_v50, %v1568_v48  ;;  %1763 = vst.msk [vmem:[%s2916_s26 + $0x8] sm:$0xf] %vm334_vm0, %v1631_v50  ;;  %v1632_v53 = vrot.slane %v1570_v51, 4 }
 0x48b   : > { %1762 = vst.msk [vmem:[%s2916_s26] sm:$0xff] %vm3127_vm7, %v1664_v52  ;;  %v1600_v54 = vpop.permute.xlu0 %1599 }
 0x48c   : > { %v1665_v55 = vsel %vm705_vm2, %v1632_v53, %v1570_v51  ;;  %1765 = vst.msk [vmem:[%s2916_s26 + $0x14] sm:$0xf] %vm334_vm0, %v1632_v53  ;;  %v1647_v56 = vrot.slane %v1600_v54, 4 }
 0x48d   : > { %1764 = vst.msk [vmem:[%s2916_s26 + $0xc] sm:$0xff] %vm3127_vm7, %v1665_v55  ;;  %v1602_v57 = vpop.permute.xlu1 %1601 }
 0x48e   : > { %v1680_v58 = vsel %vm705_vm2, %v1647_v56, %v1600_v54  ;;  %1795 = vst.msk [vmem:[%s2916_s26 + $0xc8] sm:$0xf] %vm334_vm0, %v1647_v56  ;;  %v1648_v59 = vrot.slane %v1602_v57, 4 }
 0x48f   : > { %1794 = vst.msk [vmem:[%s2916_s26 + $0xc0] sm:$0xff] %vm3127_vm7, %v1680_v58  ;;  %v1572_v60 = vpop.permute.xlu0 %1571 }
 0x490   : > { %v1681_v61 = vsel %vm705_vm2, %v1648_v59, %v1602_v57  ;;  %1797 = vst.msk [vmem:[%s2916_s26 + $0xd4] sm:$0xf] %vm334_vm0, %v1648_v59  ;;  %v1633_v62 = vrot.slane %v1572_v60, 4 }
 0x491   : > { %1796 = vst.msk [vmem:[%s2916_s26 + $0xcc] sm:$0xff] %vm3127_vm7, %v1681_v61  ;;  %v1574_v63 = vpop.permute.xlu1 %1573 }
 0x492   : > { %v1666_v1 = vsel %vm705_vm2, %v1633_v62, %v1572_v60  ;;  %1767 = vst.msk [vmem:[%s2916_s26 + $0x20] sm:$0xf] %vm334_vm0, %v1633_v62  ;;  %v1634_v2 = vrot.slane %v1574_v63, 4 }
 0x493   : > { %1766 = vst.msk [vmem:[%s2916_s26 + $0x18] sm:$0xff] %vm3127_vm7, %v1666_v1  ;;  %v1604_v3 = vpop.permute.xlu0 %1603 }
 0x494   : > { %v1667_v4 = vsel %vm705_vm2, %v1634_v2, %v1574_v63  ;;  %1769 = vst.msk [vmem:[%s2916_s26 + $0x2c] sm:$0xf] %vm334_vm0, %v1634_v2  ;;  %v1649_v5 = vrot.slane %v1604_v3, 4 }
 0x495   : > { %1768 = vst.msk [vmem:[%s2916_s26 + $0x24] sm:$0xff] %vm3127_vm7, %v1667_v4  ;;  %v1606_v6 = vpop.permute.xlu1 %1605 }
 0x496   : > { %v1682_v7 = vsel %vm705_vm2, %v1649_v5, %v1604_v3  ;;  %1799 = vst.msk [vmem:[%s2916_s26 + $0xe0] sm:$0xf] %vm334_vm0, %v1649_v5  ;;  %v1650_v8 = vrot.slane %v1606_v6, 4 }
 0x497   : > { %1798 = vst.msk [vmem:[%s2916_s26 + $0xd8] sm:$0xff] %vm3127_vm7, %v1682_v7  ;;  %v1576_v9 = vpop.permute.xlu0 %1575 }
 0x498   : > { %v1683_v10 = vsel %vm705_vm2, %v1650_v8, %v1606_v6  ;;  %1801 = vst.msk [vmem:[%s2916_s26 + $0xec] sm:$0xf] %vm334_vm0, %v1650_v8  ;;  %v1635_v11 = vrot.slane %v1576_v9, 4 }
 0x499   : > { %1800 = vst.msk [vmem:[%s2916_s26 + $0xe4] sm:$0xff] %vm3127_vm7, %v1683_v10  ;;  %v1578_v12 = vpop.permute.xlu1 %1577 }
 0x49a   : > { %v1668_v13 = vsel %vm705_vm2, %v1635_v11, %v1576_v9  ;;  %1771 = vst.msk [vmem:[%s2916_s26 + $0x38] sm:$0xf] %vm334_vm0, %v1635_v11  ;;  %v1636_v14 = vrot.slane %v1578_v12, 4 }
 0x49b   : > { %1770 = vst.msk [vmem:[%s2916_s26 + $0x30] sm:$0xff] %vm3127_vm7, %v1668_v13  ;;  %v1608_v15 = vpop.permute.xlu0 %1607 }
 0x49c   : > { %v1669_v16 = vsel %vm705_vm2, %v1636_v14, %v1578_v12  ;;  %1773 = vst.msk [vmem:[%s2916_s26 + $0x44] sm:$0xf] %vm334_vm0, %v1636_v14  ;;  %v1651_v17 = vrot.slane %v1608_v15, 4 }
 0x49d   : > { %1772 = vst.msk [vmem:[%s2916_s26 + $0x3c] sm:$0xff] %vm3127_vm7, %v1669_v16  ;;  %v1610_v18 = vpop.permute.xlu1 %1609 }
 0x49e   : > { %v1684_v19 = vsel %vm705_vm2, %v1651_v17, %v1608_v15  ;;  %1803 = vst.msk [vmem:[%s2916_s26 + $0xf8] sm:$0xf] %vm334_vm0, %v1651_v17  ;;  %v1652_v47 = vrot.slane %v1610_v18, 4 }
 0x49f   : > { %1802 = vst.msk [vmem:[%s2916_s26 + $0xf0] sm:$0xff] %vm3127_vm7, %v1684_v19  ;;  %v1580_v20 = vpop.permute.xlu0 %1579 }
 0x4a0   : > { %v1685_v21 = vsel %vm705_vm2, %v1652_v47, %v1610_v18  ;;  %1805 = vst.msk [vmem:[%s2916_s26 + $0x104] sm:$0xf] %vm334_vm0, %v1652_v47  ;;  %v1637_v22 = vrot.slane %v1580_v20, 4 }
 0x4a1   : > { %1804 = vst.msk [vmem:[%s2916_s26 + $0xfc] sm:$0xff] %vm3127_vm7, %v1685_v21  ;;  %v1582_v23 = vpop.permute.xlu1 %1581 }
 0x4a2   : > { %v1670_v24 = vsel %vm705_vm2, %v1637_v22, %v1580_v20  ;;  %1775 = vst.msk [vmem:[%s2916_s26 + $0x50] sm:$0xf] %vm334_vm0, %v1637_v22  ;;  %v1638_v25 = vrot.slane %v1582_v23, 4 }
 0x4a3   : > { %1774 = vst.msk [vmem:[%s2916_s26 + $0x48] sm:$0xff] %vm3127_vm7, %v1670_v24  ;;  %v1612_v26 = vpop.permute.xlu0 %1611 }
 0x4a4   : > { %v1671_v27 = vsel %vm705_vm2, %v1638_v25, %v1582_v23  ;;  %1777 = vst.msk [vmem:[%s2916_s26 + $0x5c] sm:$0xf] %vm334_vm0, %v1638_v25  ;;  %v1653_v28 = vrot.slane %v1612_v26, 4 }
 0x4a5   : > { %1776 = vst.msk [vmem:[%s2916_s26 + $0x54] sm:$0xff] %vm3127_vm7, %v1671_v27  ;;  %v1614_v29 = vpop.permute.xlu1 %1613 }
 0x4a6   : > { %v1686_v30 = vsel %vm705_vm2, %v1653_v28, %v1612_v26  ;;  %1807 = vst.msk [vmem:[%s2916_s26 + $0x110] sm:$0xf] %vm334_vm0, %v1653_v28  ;;  %v1654_v31 = vrot.slane %v1614_v29, 4 }
 0x4a7   : > { %1806 = vst.msk [vmem:[%s2916_s26 + $0x108] sm:$0xff] %vm3127_vm7, %v1686_v30  ;;  %v1584_v32 = vpop.permute.xlu0 %1583 }
 0x4a8   : > { %v1687_v33 = vsel %vm705_vm2, %v1654_v31, %v1614_v29  ;;  %1809 = vst.msk [vmem:[%s2916_s26 + $0x11c] sm:$0xf] %vm334_vm0, %v1654_v31  ;;  %v1639_v34 = vrot.slane %v1584_v32, 4 }
 0x4a9   : > { %1808 = vst.msk [vmem:[%s2916_s26 + $0x114] sm:$0xff] %vm3127_vm7, %v1687_v33  ;;  %v1586_v35 = vpop.permute.xlu1 %1585 }
 0x4aa   : > { %v1672_v36 = vsel %vm705_vm2, %v1639_v34, %v1584_v32  ;;  %1779 = vst.msk [vmem:[%s2916_s26 + $0x68] sm:$0xf] %vm334_vm0, %v1639_v34  ;;  %v1640_v37 = vrot.slane %v1586_v35, 4 }
 0x4ab   : > { %1778 = vst.msk [vmem:[%s2916_s26 + $0x60] sm:$0xff] %vm3127_vm7, %v1672_v36  ;;  %v1616_v38 = vpop.permute.xlu0 %1615 }
 0x4ac   : > { %v1673_v39 = vsel %vm705_vm2, %v1640_v37, %v1586_v35  ;;  %1781 = vst.msk [vmem:[%s2916_s26 + $0x74] sm:$0xf] %vm334_vm0, %v1640_v37  ;;  %v1655_v40 = vrot.slane %v1616_v38, 4 }
 0x4ad   : > { %1780 = vst.msk [vmem:[%s2916_s26 + $0x6c] sm:$0xff] %vm3127_vm7, %v1673_v39  ;;  %v1618_v41 = vpop.permute.xlu1 %1617 }
 0x4ae   : > { %v1688_v42 = vsel %vm705_vm2, %v1655_v40, %v1616_v38  ;;  %1811 = vst.msk [vmem:[%s2916_s26 + $0x128] sm:$0xf] %vm334_vm0, %v1655_v40  ;;  %v1656_v43 = vrot.slane %v1618_v41, 4 }
 0x4af   : > { %1810 = vst.msk [vmem:[%s2916_s26 + $0x120] sm:$0xff] %vm3127_vm7, %v1688_v42  ;;  %v1588_v44 = vpop.permute.xlu0 %1587 }
 0x4b0   : > { %v1689_v45 = vsel %vm705_vm2, %v1656_v43, %v1618_v41  ;;  %1813 = vst.msk [vmem:[%s2916_s26 + $0x134] sm:$0xf] %vm334_vm0, %v1656_v43  ;;  %v1641_v46 = vrot.slane %v1588_v44, 4 }
 0x4b1   : > { %1812 = vst.msk [vmem:[%s2916_s26 + $0x12c] sm:$0xff] %vm3127_vm7, %v1689_v45  ;;  %v1590_v0 = vpop.permute.xlu1 %1589 }
 0x4b2   : > { %v1674_v48 = vsel %vm705_vm2, %v1641_v46, %v1588_v44  ;;  %1783 = vst.msk [vmem:[%s2916_s26 + $0x80] sm:$0xf] %vm334_vm0, %v1641_v46  ;;  %v1642_v50 = vrot.slane %v1590_v0, 4 }
 0x4b3   : > { %1782 = vst.msk [vmem:[%s2916_s26 + $0x78] sm:$0xff] %vm3127_vm7, %v1674_v48  ;;  %v1620_v51 = vpop.permute.xlu0 %1619 }
 0x4b4   : > { %v1675_v52 = vsel %vm705_vm2, %v1642_v50, %v1590_v0  ;;  %1785 = vst.msk [vmem:[%s2916_s26 + $0x8c] sm:$0xf] %vm334_vm0, %v1642_v50  ;;  %v1657_v53 = vrot.slane %v1620_v51, 4 }
 0x4b5   : > { %1784 = vst.msk [vmem:[%s2916_s26 + $0x84] sm:$0xff] %vm3127_vm7, %v1675_v52  ;;  %v1622_v54 = vpop.permute.xlu1 %1621 }
 0x4b6   : > { %v1690_v55 = vsel %vm705_vm2, %v1657_v53, %v1620_v51  ;;  %1815 = vst.msk [vmem:[%s2916_s26 + $0x140] sm:$0xf] %vm334_vm0, %v1657_v53  ;;  %v1658_v56 = vrot.slane %v1622_v54, 4 }
 0x4b7   : > { %1814 = vst.msk [vmem:[%s2916_s26 + $0x138] sm:$0xff] %vm3127_vm7, %v1690_v55  ;;  %v1592_v57 = vpop.permute.xlu0 %1591 }
 0x4b8   : > { %v1691_v58 = vsel %vm705_vm2, %v1658_v56, %v1622_v54  ;;  %1817 = vst.msk [vmem:[%s2916_s26 + $0x14c] sm:$0xf] %vm334_vm0, %v1658_v56  ;;  %v1643_v59 = vrot.slane %v1592_v57, 4 }
 0x4b9   : > { %1816 = vst.msk [vmem:[%s2916_s26 + $0x144] sm:$0xff] %vm3127_vm7, %v1691_v58  ;;  %v1594_v60 = vpop.permute.xlu1 %1593 }
 0x4ba   : > { %v1676_v61 = vsel %vm705_vm2, %v1643_v59, %v1592_v57  ;;  %1787 = vst.msk [vmem:[%s2916_s26 + $0x98] sm:$0xf] %vm334_vm0, %v1643_v59  ;;  %v1644_v62 = vrot.slane %v1594_v60, 4 }
 0x4bb   : > { %1786 = vst.msk [vmem:[%s2916_s26 + $0x90] sm:$0xff] %vm3127_vm7, %v1676_v61  ;;  %v1624_v63 = vpop.permute.xlu0 %1623 }
 0x4bc   : > { %v1677_v1 = vsel %vm705_vm2, %v1644_v62, %v1594_v60  ;;  %1789 = vst.msk [vmem:[%s2916_s26 + $0xa4] sm:$0xf] %vm334_vm0, %v1644_v62  ;;  %v1659_v2 = vrot.slane %v1624_v63, 4 }
 0x4bd   : > { %1788 = vst.msk [vmem:[%s2916_s26 + $0x9c] sm:$0xff] %vm3127_vm7, %v1677_v1  ;;  %v1626_v3 = vpop.permute.xlu1 %1625 }
 0x4be   : > { %v1692_v4 = vsel %vm705_vm2, %v1659_v2, %v1624_v63  ;;  %1819 = vst.msk [vmem:[%s2916_s26 + $0x158] sm:$0xf] %vm334_vm0, %v1659_v2  ;;  %v1660_v5 = vrot.slane %v1626_v3, 4 }
 0x4bf   : > { %1818 = vst.msk [vmem:[%s2916_s26 + $0x150] sm:$0xff] %vm3127_vm7, %v1692_v4  ;;  %v1596_v6 = vpop.permute.xlu0 %1595 }
 0x4c0   : > { %v1693_v7 = vsel %vm705_vm2, %v1660_v5, %v1626_v3  ;;  %1821 = vst.msk [vmem:[%s2916_s26 + $0x164] sm:$0xf] %vm334_vm0, %v1660_v5  ;;  %v1645_v8 = vrot.slane %v1596_v6, 4 }
 0x4c1   : > { %1820 = vst.msk [vmem:[%s2916_s26 + $0x15c] sm:$0xff] %vm3127_vm7, %v1693_v7  ;;  %v1598_v9 = vpop.permute.xlu1 %1597 }
 0x4c2   : > { %v1678_v10 = vsel %vm705_vm2, %v1645_v8, %v1596_v6  ;;  %1791 = vst.msk [vmem:[%s2916_s26 + $0xb0] sm:$0xf] %vm334_vm0, %v1645_v8  ;;  %v1646_v11 = vrot.slane %v1598_v9, 4 }
 0x4c3   : > { %1790 = vst.msk [vmem:[%s2916_s26 + $0xa8] sm:$0xff] %vm3127_vm7, %v1678_v10  ;;  %v1628_v12 = vpop.permute.xlu0 %1627 }
 0x4c4   : > { %v1679_v13 = vsel %vm705_vm2, %v1646_v11, %v1598_v9  ;;  %1793 = vst.msk [vmem:[%s2916_s26 + $0xbc] sm:$0xf] %vm334_vm0, %v1646_v11  ;;  %v1661_v14 = vrot.slane %v1628_v12, 4 }
 0x4c5   : > { %1792 = vst.msk [vmem:[%s2916_s26 + $0xb4] sm:$0xff] %vm3127_vm7, %v1679_v13  ;;  %v1630_v15 = vpop.permute.xlu1 %1629 }
 0x4c6   : > { %v1694_v16 = vsel %vm705_vm2, %v1661_v14, %v1628_v12  ;;  %1823 = vst.msk [vmem:[%s2916_s26 + $0x170] sm:$0xf] %vm334_vm0, %v1661_v14  ;;  %v1662_v17 = vrot.slane %v1630_v15, 4 }
 0x4c7   : > { %1822 = vst.msk [vmem:[%s2916_s26 + $0x168] sm:$0xff] %vm3127_vm7, %v1694_v16 }
 0x4c8   : > { %v1695_v18 = vsel %vm705_vm2, %v1662_v17, %v1630_v15  ;;  %1825 = vst.msk [vmem:[%s2916_s26 + $0x17c] sm:$0xf] %vm334_vm0, %v1662_v17 }
 0x4c9   : > { %1824 = vst.msk [vmem:[%s2916_s26 + $0x174] sm:$0xff] %vm3127_vm7, %v1695_v18 }
 0x4ca   : > { %2579 = shalt.err (!%p2576_p13)
}
 0x4cb   : > { %s2580_s27 = scalar_lea.hbm %s3319_s6, 6144  ;;  %s2584_s24 = scalar_lea.hbm %s3379_s5, 12288 }
 0x4cc   : > { %p2581_p0 = scmp.ne.s32.totalorder %s3319_s6, %s2580_s27  ;;  %p2585_p1 = scmp.lt.u32.totalorder %s3319_s6, %s3379_s5 }
 0x4cd   : > { %p2586_p2 = scmp.lt.u32.totalorder %s2584_s24, %s2580_s27  ;;  %p2588_p6 = scmp.lt.u32.totalorder %s2580_s27, %s3319_s6 }
 0x4ce   : > { %p2582_p5 = pnand %p2581_p0, %p2841_p8 }
 0x4cf   : > { %p2587_p4 = por %p2586_p2, %p2585_p1 }
 0x4d0   : > { %p2583_p11 = pneg %p2582_p5 }
 0x4d1   : > { %p2589_p10 = por %p2588_p6, %p2587_p4 }
 0x4d3   : > { %p2590_p12 = pnand %p2589_p10, %p2583_p11 }
 0x4d5   : > { %2593 = shalt.err (!%p2590_p12)
}
 0x4d6   : > { %s2658_s17 = smov 192   ;;  %s2659_s22 = smov 12  }
 0x4d7   : > { %2287 = dma.vmem_to_hbm [thread:$0]  (%p2841_p8), %s3321_s7, 6144, %s3319_s6, %s1827_s28, %s2658_s17, %s2658_s17, %s2659_s22  }
 0x4d8 PF: > { %s1855_s12 = sand.u32 1, %s2628_s18   ;;  %p3399_p3 = scmp.ne.s32.totalorder %s3384_s25, 0 }
 0x4d9   : > { %p3400_p7 = scmp.ge.s32.totalorder %s2640_s21, 2  ;;  %s1856_s29 = scalar_lea.sflag [#allocation5], %s1855_s12 }
 0x4db   : > { %p2307_p9 = pnand %p3400_p7, %p3399_p3 }
 0x4dd   : > { %2623 = dma.done.wait (!%p2307_p9), %s1856_s29, 6144  }
 0x4de   : > { %2625 = vsyncadd (!%p2307_p9), %s1856_s29, 4294961152  ;;  %p20_p13 = scmp.ge.s32.totalorder %s2828_s23, 4   ;;  %s3401_s18 = smov %s2632_s19 }
 0x4df   : > { %s3402_s19 = smov %s2636_s20  ;;  %s3403_s20 = smov %s2837_s9 }
 0x4e0   : > { %s3404_s21 = smov %s2828_s23  ;;  %22 = sbr.rel (!%p20_p13) target bundleno = 7 (0x7), region = 107 }
 0x4e7   :  { %1861 = vsyncpa [#allocation4], 1 }
 0x4e8   :  { %1863 = vsyncpa [#allocation4 + $0x1], 1 }
 0x4e9   :  { %1864 = vsyncpa [#allocation7], 1 }
 0x4ea   :  { %1865 = vsyncpa [#allocation10], 1 }
 0x4eb   :  { %1866 = vsyncpa [#allocation5], 1 }
 0x4ec   :  { %1868 = vsyncpa [#allocation5 + $0x1], 1 }

</bundles_post_ra>
